<compile_context>
chip_gen: v6e
topology: v6e:2x2x1
jax: 0.10.0
libtpu: 0.0.40
codegen_flags: <defaults>
</compile_context>

<pallas_src>
import jax
import jax.numpy as jnp
from jax.experimental import pallas as pl
from jax.experimental.pallas import tpu as pltpu  # noqa: F401  (TPU backend)

D_MODEL = 32
N_HEAD = 4
HEAD_DIM = D_MODEL // N_HEAD
DIM_FF = 64
NUM_LAYERS = 2
EPS = 1e-5

# slab layout constants
_W_WIDTH = max(2 * D_MODEL, DIM_FF)          # 64 lanes
_W_ROWS = 3 * D_MODEL + DIM_FF               # 160 rows per layer
_B_ROWS = 9                                  # bias/LN rows per layer


def _layer_norm(x, w, b):
    mu = jnp.mean(x, axis=-1, keepdims=True)
    var = jnp.mean((x - mu) ** 2, axis=-1, keepdims=True)
    return (x - mu) * jax.lax.rsqrt(var + EPS) * w + b


# --------------------------- fused Pallas kernel ---------------------------
def _make_encoder_kernel(batch, seq):
    D = D_MODEL
    hd = HEAD_DIM

    def encoder_kernel(x_ref, pos_ref, wslab_ref, bslab_ref, out_ref):
        num_layers = wslab_ref.shape[0]
        x = x_ref[...]                        # (B*S, D) f32, batch-major rows
        pos = pos_ref[...]                    # (B*S, D) f32

        for l in range(num_layers):           # static unroll; slabs resident in VMEM
            # ---- unpack per-layer slabs (all static slices) ----
            wqk = wslab_ref[l, 0:D, 0:2 * D]                  # (D, 2D) bf16, Q-half pre-scaled
            wv = wslab_ref[l, D:2 * D, 0:D]                   # (D, D)  bf16
            wo = wslab_ref[l, D:2 * D, D:2 * D]               # (D, D)  bf16
            w1 = wslab_ref[l, 2 * D:3 * D, 0:DIM_FF]          # (D, FF) bf16
            w2 = wslab_ref[l, 3 * D:3 * D + DIM_FF, 0:D]      # (FF, D) bf16

            bqk = bslab_ref[l, 0:1, 0:2 * D]                  # (1, 2D) f32, Q-half pre-scaled
            bv = bslab_ref[l, 1:2, 0:D]
            bo = bslab_ref[l, 2:3, 0:D]
            b1 = bslab_ref[l, 3:4, 0:DIM_FF]
            b2 = bslab_ref[l, 4:5, 0:D]
            ln1w = bslab_ref[l, 5:6, 0:D]
            ln1b = bslab_ref[l, 6:7, 0:D]
            ln2w = bslab_ref[l, 7:8, 0:D]
            ln2b = bslab_ref[l, 8:9, 0:D]

            # ---- fused Q|K and V projections: wide 2D matmuls over the whole slab ----
            xp_bf = (x + pos).astype(jnp.bfloat16)            # q/k input (pos added)
            x_bf = x.astype(jnp.bfloat16)                     # v input
            qk = jnp.dot(xp_bf, wqk, preferred_element_type=jnp.float32) + bqk   # (B*S, 2D)
            v = jnp.dot(x_bf, wv, preferred_element_type=jnp.float32) + bv       # (B*S, D)
            qk_bf = qk.astype(jnp.bfloat16)   # 1/sqrt(hd) already folded into Q weights/bias
            v_bf = v.astype(jnp.bfloat16)

            # ---- attention: unrolled over (batch, head) 8x8 tiles ----
            attn_parts = []
            for b in range(batch):
                r0 = b * seq
                head_outs = []
                for h in range(N_HEAD):
                    c0 = h * hd
                    q_bh = qk_bf[r0:r0 + seq, c0:c0 + hd]              # (S, hd)
                    k_bh = qk_bf[r0:r0 + seq, D + c0:D + c0 + hd]      # (S, hd)
                    v_bh = v_bf[r0:r0 + seq, c0:c0 + hd]               # (S, hd)
                    s = jnp.einsum('sd,td->st', q_bh, k_bh,
                                   preferred_element_type=jnp.float32)  # (S, S) f32
                    s = s - jnp.max(s, axis=-1, keepdims=True)
                    e = jnp.exp(s)
                    p = e * pl.reciprocal(jnp.sum(e, axis=-1, keepdims=True), approx=True)
                    head_outs.append(jnp.dot(p.astype(jnp.bfloat16), v_bh,
                                             preferred_element_type=jnp.float32))
                attn_parts.append(jnp.concatenate(head_outs, axis=-1))   # (S, D)
            attn = jnp.concatenate(attn_parts, axis=0)                   # (B*S, D) f32

            # ---- output projection (one wide push) + residual + LayerNorm 1 ----
            attn = jnp.dot(attn.astype(jnp.bfloat16), wo,
                           preferred_element_type=jnp.float32) + bo
            x1 = _layer_norm(x + attn, ln1w, ln1b)

            # ---- FFN: Linear -> ReLU -> Linear ----
            hdn = jnp.dot(x1.astype(jnp.bfloat16), w1,
                          preferred_element_type=jnp.float32) + b1
            hdn = jnp.maximum(hdn, 0.0)
            ffn = jnp.dot(hdn.astype(jnp.bfloat16), w2,
                          preferred_element_type=jnp.float32) + b2

            # ---- residual + LayerNorm 2 ----
            x = _layer_norm(x1 + ffn, ln2w, ln2b)

        out_ref[...] = x

    return encoder_kernel


# --------------------------- one-time weight packing (hoisted out of hot path) ----------
def prepare_params(layer_params):
    """PyTorch-layout (out,in) weights -> pre-transposed, Q/K-fused (scale folded into Q),
    packed into one bf16 weight slab (L, 160, 64) and one f32 bias/LN slab (L, 9, 64)."""
    assert DIM_FF <= _W_WIDTH and 2 * D_MODEL <= _W_WIDTH
    scale = HEAD_DIM ** -0.5
    w_slabs, b_slabs = [], []
    for p in layer_params:
        wqk = jnp.concatenate([p["wq"].T * scale, p["wk"].T], axis=1)       # (D, 2D)
        wvo = jnp.concatenate([p["wv"].T, p["wo"].T], axis=1)               # (D, 2D)
        w1 = jnp.concatenate(
            [p["w1"].T, jnp.zeros((D_MODEL, _W_WIDTH - DIM_FF), jnp.float32)], axis=1)
        w2 = jnp.concatenate(
            [p["w2"].T, jnp.zeros((DIM_FF, _W_WIDTH - D_MODEL), jnp.float32)], axis=1)
        w_slabs.append(jnp.concatenate([wqk, wvo, w1, w2], axis=0).astype(jnp.bfloat16))

        def row(a, s=1.0):
            a = a.reshape(1, -1) * s
            return jnp.concatenate(
                [a, jnp.zeros((1, _W_WIDTH - a.shape[1]), jnp.float32)], axis=1)

        b_rows = [
            row(jnp.concatenate([p["bq"].reshape(1, -1) * scale,
                                 p["bk"].reshape(1, -1)], axis=1)),          # bqk
            row(p["bv"]), row(p["bo"]), row(p["b1"]), row(p["b2"]),
            row(p["ln1w"]), row(p["ln1b"]), row(p["ln2w"]), row(p["ln2b"]),
        ]
        b_slabs.append(jnp.concatenate(b_rows, axis=0))                      # (9, 64) f32

    return jnp.stack(w_slabs), jnp.stack(b_slabs)    # (L,160,64) bf16, (L,9,64) f32


# --------------------------- wrapper ---------------------------
def transformer_encoder(src_sbd, pos_sbd, wslab, bslab, norm_params=None):
    """src/pos: (S, B, D) seq-first (PyTorch convention). Returns (S, B, D)."""
    S, B, D = src_sbd.shape
    # Boundary transposes/reshapes stay in the wrapper (tiny tensors, single fused kernel).
    x = jnp.transpose(src_sbd, (1, 0, 2)).reshape(B * S, D)
    pos = jnp.transpose(pos_sbd, (1, 0, 2)).reshape(B * S, D)

    kernel = _make_encoder_kernel(B, S)
    out = pl.pallas_call(
        kernel,
        out_shape=jax.ShapeDtypeStruct((B * S, D), jnp.float32),
        grid=(1,),
        in_specs=[
            pl.BlockSpec((B * S, D), lambda i: (0, 0)),
            pl.BlockSpec((B * S, D), lambda i: (0, 0)),
            pl.BlockSpec(wslab.shape, lambda i: (0, 0, 0)),
            pl.BlockSpec(bslab.shape, lambda i: (0, 0, 0)),
        ],
        out_specs=pl.BlockSpec((B * S, D), lambda i: (0, 0)),
    )(x, pos, wslab, bslab)

    out = out.reshape(B, S, D)
    if norm_params is not None:               # optional final LayerNorm (norm=None here)
        out = _layer_norm(out, norm_params["w"], norm_params["b"])
    return jnp.transpose(out, (1, 0, 2))      # back to (S, B, D)


# --------------------------- pure-JAX reference ---------------------------
# Mirrors the kernel's numerics (bf16 matmul operands, f32 accumulation / elementwise),
# but uses the original PyTorch-layout weights and the canonical multi-head formulation,
# so it cross-checks the slab packing, Q/K fusion and scale folding.
def _ref_layer(x, pos, p):                    # x, pos: (B, S, D) f32
    B, S, D = x.shape
    hd = HEAD_DIM
    bf = lambda a: a.astype(jnp.bfloat16)
    lin = lambda a, w: jnp.einsum('bsd,ed->bse', bf(a), bf(w),
                                  preferred_element_type=jnp.float32)
    qk_in = x + pos
    q = lin(qk_in, p["wq"]) + p["bq"]
    k = lin(qk_in, p["wk"]) + p["bk"]
    v = lin(x, p["wv"]) + p["bv"]
    qh = q.reshape(B, S, N_HEAD, hd).transpose(0, 2, 1, 3) * (hd ** -0.5)
    kh = k.reshape(B, S, N_HEAD, hd).transpose(0, 2, 1, 3)
    vh = v.reshape(B, S, N_HEAD, hd).transpose(0, 2, 1, 3)
    scores = jnp.einsum('bhsd,bhtd->bhst', bf(qh), bf(kh),
                        preferred_element_type=jnp.float32)
    attn = jax.nn.softmax(scores, axis=-1)
    o = jnp.einsum('bhst,bhtd->bhsd', bf(attn), bf(vh),
                   preferred_element_type=jnp.float32)
    o = o.transpose(0, 2, 1, 3).reshape(B, S, D)
    o = lin(o, p["wo"]) + p["bo"]
    x1 = _layer_norm(x + o, p["ln1w"], p["ln1b"])
    h = jnp.maximum(lin(x1, p["w1"]) + p["b1"], 0.0)
    ffn = lin(h, p["w2"]) + p["b2"]
    return _layer_norm(x1 + ffn, p["ln2w"], p["ln2b"])


def _ref_encoder(src_sbd, pos_sbd, layer_params):
    x = jnp.transpose(src_sbd, (1, 0, 2))
    pos = jnp.transpose(pos_sbd, (1, 0, 2))
    for p in layer_params:
        x = _ref_layer(x, pos, p)
    return jnp.transpose(x, (1, 0, 2))


# --------------------------- deterministic init ---------------------------
def _init_layer_params(key):
    ks = jax.random.split(key, 12)
    n = lambda k, shape, s=0.05: (s * jax.random.normal(k, shape)).astype(jnp.float32)
    return {
        "wq": n(ks[0], (D_MODEL, D_MODEL)), "bq": n(ks[1], (1, D_MODEL)),
        "wk": n(ks[2], (D_MODEL, D_MODEL)), "bk": n(ks[3], (1, D_MODEL)),
        "wv": n(ks[4], (D_MODEL, D_MODEL)), "bv": n(ks[5], (1, D_MODEL)),
        "wo": n(ks[6], (D_MODEL, D_MODEL)), "bo": n(ks[7], (1, D_MODEL)),
        "ln1w": jnp.ones((1, D_MODEL), jnp.float32),
        "ln1b": jnp.zeros((1, D_MODEL), jnp.float32),
        "w1": n(ks[8], (DIM_FF, D_MODEL)), "b1": n(ks[9], (1, DIM_FF)),
        "w2": n(ks[10], (D_MODEL, DIM_FF)), "b2": n(ks[11], (1, D_MODEL)),
        "ln2w": jnp.ones((1, D_MODEL), jnp.float32),
        "ln2b": jnp.zeros((1, D_MODEL), jnp.float32),
    }


if __name__ == "__main__":
    key = jax.random.PRNGKey(0)
    k_src, k_pos, k_params = jax.random.split(key, 3)

    B, S = 2, 8
    src = jax.random.normal(k_src, (S, B, D_MODEL), dtype=jnp.float32)   # (S, B, D) seq-first
    pos = jax.random.normal(k_pos, (S, B, D_MODEL), dtype=jnp.float32)

    layer_keys = jax.random.split(k_params, NUM_LAYERS)
    layer_params = [_init_layer_params(k) for k in layer_keys]

    # Weight packing done ONCE, outside the forward path (perf review item).
    wslab, bslab = prepare_params(layer_params)

    fwd = jax.jit(transformer_encoder)
    out = jax.block_until_ready(fwd(src, pos, wslab, bslab))

    ref = _ref_encoder(src, pos, layer_params)
    assert out.shape == (S, B, D_MODEL)
    # Tolerance covers bf16 MXU operands + approx softmax reciprocal (both intentional).
    max_err = float(jnp.max(jnp.abs(out - ref)))
    assert jnp.allclose(out, ref, atol=1e-2, rtol=1e-2), \
        f"mismatch vs reference (max abs err {max_err})"

    print("KERNEL_OK")
</pallas_src>

<mosaic_0001>
module attributes {stable_mosaic.version = 11 : i64} {
  func.func @encoder_kernel(%arg0: i32, %arg1: memref<16x32xf32, #tpu.memory_space<vmem>>, %arg2: memref<16x32xf32, #tpu.memory_space<vmem>>, %arg3: memref<2x160x64xbf16, #tpu.memory_space<vmem>>, %arg4: memref<2x9x64xf32, #tpu.memory_space<vmem>>, %arg5: memref<16x32xf32, #tpu.memory_space<vmem>>) attributes {dimension_semantics = [#tpu.dimension_semantics<arbitrary>], iteration_bounds = array<i64: 1>, scalar_prefetch = 0 : i64, scratch_operands = 0 : i64, tpu.core_type = #tpu.core_type<tc>, window_params = [{pipeline_mode = #tpu.pipeline_mode<synchronous>, transform_indices = @transform_0, window_bounds = array<i64: 16, 32>}, {pipeline_mode = #tpu.pipeline_mode<synchronous>, transform_indices = @transform_1, window_bounds = array<i64: 16, 32>}, {pipeline_mode = #tpu.pipeline_mode<synchronous>, transform_indices = @transform_2, window_bounds = array<i64: 2, 160, 64>}, {pipeline_mode = #tpu.pipeline_mode<synchronous>, transform_indices = @transform_3, window_bounds = array<i64: 2, 9, 64>}, {pipeline_mode = #tpu.pipeline_mode<synchronous>, transform_indices = @transform_4, window_bounds = array<i64: 16, 32>}]} {
    %c0 = arith.constant 0 : index
    %c0_0 = arith.constant 0 : index
    %0 = vector.load %arg1[%c0, %c0_0] : memref<16x32xf32, #tpu.memory_space<vmem>>, vector<16x32xf32>
    %c0_1 = arith.constant 0 : index
    %c0_2 = arith.constant 0 : index
    %1 = vector.load %arg2[%c0_1, %c0_2] : memref<16x32xf32, #tpu.memory_space<vmem>>, vector<16x32xf32>
    %c0_3 = arith.constant 0 : index
    %c0_4 = arith.constant 0 : index
    %c0_5 = arith.constant 0 : index
    %2 = vector.load %arg3[%c0_3, %c0_4, %c0_5] : memref<2x160x64xbf16, #tpu.memory_space<vmem>>, vector<1x32x64xbf16>
    %3 = vector.shape_cast %2 : vector<1x32x64xbf16> to vector<32x64xbf16>
    %c0_6 = arith.constant 0 : index
    %c32 = arith.constant 32 : index
    %c0_7 = arith.constant 0 : index
    %4 = vector.load %arg3[%c0_6, %c32, %c0_7] : memref<2x160x64xbf16, #tpu.memory_space<vmem>>, vector<1x32x32xbf16>
    %5 = vector.shape_cast %4 : vector<1x32x32xbf16> to vector<32x32xbf16>
    %c0_8 = arith.constant 0 : index
    %c32_9 = arith.constant 32 : index
    %c32_10 = arith.constant 32 : index
    %6 = vector.load %arg3[%c0_8, %c32_9, %c32_10] : memref<2x160x64xbf16, #tpu.memory_space<vmem>>, vector<1x32x32xbf16>
    %7 = vector.shape_cast %6 : vector<1x32x32xbf16> to vector<32x32xbf16>
    %c0_11 = arith.constant 0 : index
    %c64 = arith.constant 64 : index
    %c0_12 = arith.constant 0 : index
    %8 = vector.load %arg3[%c0_11, %c64, %c0_12] : memref<2x160x64xbf16, #tpu.memory_space<vmem>>, vector<1x32x64xbf16>
    %9 = vector.shape_cast %8 : vector<1x32x64xbf16> to vector<32x64xbf16>
    %c0_13 = arith.constant 0 : index
    %c96 = arith.constant 96 : index
    %c0_14 = arith.constant 0 : index
    %10 = vector.load %arg3[%c0_13, %c96, %c0_14] : memref<2x160x64xbf16, #tpu.memory_space<vmem>>, vector<1x64x32xbf16>
    %11 = vector.shape_cast %10 : vector<1x64x32xbf16> to vector<64x32xbf16>
    %c0_15 = arith.constant 0 : index
    %c0_16 = arith.constant 0 : index
    %c0_17 = arith.constant 0 : index
    %12 = vector.load %arg4[%c0_15, %c0_16, %c0_17] : memref<2x9x64xf32, #tpu.memory_space<vmem>>, vector<1x1x64xf32>
    %13 = vector.shape_cast %12 : vector<1x1x64xf32> to vector<1x64xf32>
    %c0_18 = arith.constant 0 : index
    %c1 = arith.constant 1 : index
    %c0_19 = arith.constant 0 : index
    %14 = vector.load %arg4[%c0_18, %c1, %c0_19] : memref<2x9x64xf32, #tpu.memory_space<vmem>>, vector<1x1x32xf32>
    %15 = vector.shape_cast %14 : vector<1x1x32xf32> to vector<1x32xf32>
    %c0_20 = arith.constant 0 : index
    %c2 = arith.constant 2 : index
    %c0_21 = arith.constant 0 : index
    %16 = vector.load %arg4[%c0_20, %c2, %c0_21] : memref<2x9x64xf32, #tpu.memory_space<vmem>>, vector<1x1x32xf32>
    %17 = vector.shape_cast %16 : vector<1x1x32xf32> to vector<1x32xf32>
    %c0_22 = arith.constant 0 : index
    %c3 = arith.constant 3 : index
    %c0_23 = arith.constant 0 : index
    %18 = vector.load %arg4[%c0_22, %c3, %c0_23] : memref<2x9x64xf32, #tpu.memory_space<vmem>>, vector<1x1x64xf32>
    %19 = vector.shape_cast %18 : vector<1x1x64xf32> to vector<1x64xf32>
    %c0_24 = arith.constant 0 : index
    %c4 = arith.constant 4 : index
    %c0_25 = arith.constant 0 : index
    %20 = vector.load %arg4[%c0_24, %c4, %c0_25] : memref<2x9x64xf32, #tpu.memory_space<vmem>>, vector<1x1x32xf32>
    %21 = vector.shape_cast %20 : vector<1x1x32xf32> to vector<1x32xf32>
    %c0_26 = arith.constant 0 : index
    %c5 = arith.constant 5 : index
    %c0_27 = arith.constant 0 : index
    %22 = vector.load %arg4[%c0_26, %c5, %c0_27] : memref<2x9x64xf32, #tpu.memory_space<vmem>>, vector<1x1x32xf32>
    %23 = vector.shape_cast %22 : vector<1x1x32xf32> to vector<1x32xf32>
    %c0_28 = arith.constant 0 : index
    %c6 = arith.constant 6 : index
    %c0_29 = arith.constant 0 : index
    %24 = vector.load %arg4[%c0_28, %c6, %c0_29] : memref<2x9x64xf32, #tpu.memory_space<vmem>>, vector<1x1x32xf32>
    %25 = vector.shape_cast %24 : vector<1x1x32xf32> to vector<1x32xf32>
    %c0_30 = arith.constant 0 : index
    %c7 = arith.constant 7 : index
    %c0_31 = arith.constant 0 : index
    %26 = vector.load %arg4[%c0_30, %c7, %c0_31] : memref<2x9x64xf32, #tpu.memory_space<vmem>>, vector<1x1x32xf32>
    %27 = vector.shape_cast %26 : vector<1x1x32xf32> to vector<1x32xf32>
    %c0_32 = arith.constant 0 : index
    %c8 = arith.constant 8 : index
    %c0_33 = arith.constant 0 : index
    %28 = vector.load %arg4[%c0_32, %c8, %c0_33] : memref<2x9x64xf32, #tpu.memory_space<vmem>>, vector<1x1x32xf32>
    %29 = vector.shape_cast %28 : vector<1x1x32xf32> to vector<1x32xf32>
    %30 = arith.addf %0, %1 : vector<16x32xf32>
    %31 = arith.truncf %30 : vector<16x32xf32> to vector<16x32xbf16>
    %32 = arith.truncf %0 : vector<16x32xf32> to vector<16x32xbf16>
    %cst = arith.constant dense<0.000000e+00> : vector<16x64xf32>
    %33 = tpu.matmul %31, %3, %cst {dimension_numbers = #tpu.dot_dimension_numbers<[1], [0], [0], [1], [0, 0, 1, 1], [], []>} : vector<16x32xbf16>, vector<32x64xbf16>, vector<16x64xf32> -> vector<16x64xf32>
    %34 = vector.broadcast %13 : vector<1x64xf32> to vector<16x64xf32>
    %35 = arith.addf %33, %34 : vector<16x64xf32>
    %cst_34 = arith.constant dense<0.000000e+00> : vector<16x32xf32>
    %36 = tpu.matmul %32, %5, %cst_34 {dimension_numbers = #tpu.dot_dimension_numbers<[1], [0], [0], [1], [0, 0, 1, 1], [], []>} : vector<16x32xbf16>, vector<32x32xbf16>, vector<16x32xf32> -> vector<16x32xf32>
    %37 = vector.broadcast %15 : vector<1x32xf32> to vector<16x32xf32>
    %38 = arith.addf %36, %37 : vector<16x32xf32>
    %39 = arith.truncf %35 : vector<16x64xf32> to vector<16x64xbf16>
    %40 = arith.truncf %38 : vector<16x32xf32> to vector<16x32xbf16>
    %41 = vector.extract_strided_slice %39 {offsets = [0, 0], sizes = [8, 8], strides = [1, 1]} : vector<16x64xbf16> to vector<8x8xbf16>
    %42 = vector.extract_strided_slice %39 {offsets = [0, 32], sizes = [8, 8], strides = [1, 1]} : vector<16x64xbf16> to vector<8x8xbf16>
    %43 = vector.extract_strided_slice %40 {offsets = [0, 0], sizes = [8, 8], strides = [1, 1]} : vector<16x32xbf16> to vector<8x8xbf16>
    "tpu.trace_start"() <{level = 10 : i32, message = "sd,td->st"}> : () -> ()
    %cst_35 = arith.constant dense<0.000000e+00> : vector<8x8xf32>
    %44 = tpu.matmul %41, %42, %cst_35 {dimension_numbers = #tpu.dot_dimension_numbers<[1], [1], [0], [0], [0, 0, 1, 0], [], []>} : vector<8x8xbf16>, vector<8x8xbf16>, vector<8x8xf32> -> vector<8x8xf32>
    "tpu.trace_stop"() : () -> ()
    %cst_36 = arith.constant dense<0xFF800000> : vector<8xf32>
    %45 = vector.multi_reduction <maximumf>, %44, %cst_36 [1] : vector<8x8xf32> to vector<8xf32>
    %46 = vector.shape_cast %45 : vector<8xf32> to vector<8x1xf32>
    %47 = vector.broadcast %46 : vector<8x1xf32> to vector<8x8xf32>
    %48 = arith.subf %44, %47 : vector<8x8xf32>
    %49 = math.exp %48 : vector<8x8xf32>
    %cst_37 = arith.constant dense<0.000000e+00> : vector<8xf32>
    %50 = vector.multi_reduction <add>, %49, %cst_37 [1] : vector<8x8xf32> to vector<8xf32>
    %51 = vector.shape_cast %50 : vector<8xf32> to vector<8x1xf32>
    %52 = tpu.reciprocal %51 {approx = true} : vector<8x1xf32> -> vector<8x1xf32>
    %53 = vector.broadcast %52 : vector<8x1xf32> to vector<8x8xf32>
    %54 = arith.mulf %49, %53 : vector<8x8xf32>
    %55 = arith.truncf %54 : vector<8x8xf32> to vector<8x8xbf16>
    %cst_38 = arith.constant dense<0.000000e+00> : vector<8x8xf32>
    %56 = tpu.matmul %55, %43, %cst_38 {dimension_numbers = #tpu.dot_dimension_numbers<[1], [0], [0], [1], [0, 0, 1, 1], [], []>} : vector<8x8xbf16>, vector<8x8xbf16>, vector<8x8xf32> -> vector<8x8xf32>
    %57 = vector.extract_strided_slice %39 {offsets = [0, 8], sizes = [8, 8], strides = [1, 1]} : vector<16x64xbf16> to vector<8x8xbf16>
    %58 = vector.extract_strided_slice %39 {offsets = [0, 40], sizes = [8, 8], strides = [1, 1]} : vector<16x64xbf16> to vector<8x8xbf16>
    %59 = vector.extract_strided_slice %40 {offsets = [0, 8], sizes = [8, 8], strides = [1, 1]} : vector<16x32xbf16> to vector<8x8xbf16>
    "tpu.trace_start"() <{level = 10 : i32, message = "sd,td->st"}> : () -> ()
    %cst_39 = arith.constant dense<0.000000e+00> : vector<8x8xf32>
    %60 = tpu.matmul %57, %58, %cst_39 {dimension_numbers = #tpu.dot_dimension_numbers<[1], [1], [0], [0], [0, 0, 1, 0], [], []>} : vector<8x8xbf16>, vector<8x8xbf16>, vector<8x8xf32> -> vector<8x8xf32>
    "tpu.trace_stop"() : () -> ()
    %cst_40 = arith.constant dense<0xFF800000> : vector<8xf32>
    %61 = vector.multi_reduction <maximumf>, %60, %cst_40 [1] : vector<8x8xf32> to vector<8xf32>
    %62 = vector.shape_cast %61 : vector<8xf32> to vector<8x1xf32>
    %63 = vector.broadcast %62 : vector<8x1xf32> to vector<8x8xf32>
    %64 = arith.subf %60, %63 : vector<8x8xf32>
    %65 = math.exp %64 : vector<8x8xf32>
    %cst_41 = arith.constant dense<0.000000e+00> : vector<8xf32>
    %66 = vector.multi_reduction <add>, %65, %cst_41 [1] : vector<8x8xf32> to vector<8xf32>
    %67 = vector.shape_cast %66 : vector<8xf32> to vector<8x1xf32>
    %68 = tpu.reciprocal %67 {approx = true} : vector<8x1xf32> -> vector<8x1xf32>
    %69 = vector.broadcast %68 : vector<8x1xf32> to vector<8x8xf32>
    %70 = arith.mulf %65, %69 : vector<8x8xf32>
    %71 = arith.truncf %70 : vector<8x8xf32> to vector<8x8xbf16>
    %cst_42 = arith.constant dense<0.000000e+00> : vector<8x8xf32>
    %72 = tpu.matmul %71, %59, %cst_42 {dimension_numbers = #tpu.dot_dimension_numbers<[1], [0], [0], [1], [0, 0, 1, 1], [], []>} : vector<8x8xbf16>, vector<8x8xbf16>, vector<8x8xf32> -> vector<8x8xf32>
    %73 = vector.extract_strided_slice %39 {offsets = [0, 16], sizes = [8, 8], strides = [1, 1]} : vector<16x64xbf16> to vector<8x8xbf16>
    %74 = vector.extract_strided_slice %39 {offsets = [0, 48], sizes = [8, 8], strides = [1, 1]} : vector<16x64xbf16> to vector<8x8xbf16>
    %75 = vector.extract_strided_slice %40 {offsets = [0, 16], sizes = [8, 8], strides = [1, 1]} : vector<16x32xbf16> to vector<8x8xbf16>
    "tpu.trace_start"() <{level = 10 : i32, message = "sd,td->st"}> : () -> ()
    %cst_43 = arith.constant dense<0.000000e+00> : vector<8x8xf32>
    %76 = tpu.matmul %73, %74, %cst_43 {dimension_numbers = #tpu.dot_dimension_numbers<[1], [1], [0], [0], [0, 0, 1, 0], [], []>} : vector<8x8xbf16>, vector<8x8xbf16>, vector<8x8xf32> -> vector<8x8xf32>
    "tpu.trace_stop"() : () -> ()
    %cst_44 = arith.constant dense<0xFF800000> : vector<8xf32>
    %77 = vector.multi_reduction <maximumf>, %76, %cst_44 [1] : vector<8x8xf32> to vector<8xf32>
    %78 = vector.shape_cast %77 : vector<8xf32> to vector<8x1xf32>
    %79 = vector.broadcast %78 : vector<8x1xf32> to vector<8x8xf32>
    %80 = arith.subf %76, %79 : vector<8x8xf32>
    %81 = math.exp %80 : vector<8x8xf32>
    %cst_45 = arith.constant dense<0.000000e+00> : vector<8xf32>
    %82 = vector.multi_reduction <add>, %81, %cst_45 [1] : vector<8x8xf32> to vector<8xf32>
    %83 = vector.shape_cast %82 : vector<8xf32> to vector<8x1xf32>
    %84 = tpu.reciprocal %83 {approx = true} : vector<8x1xf32> -> vector<8x1xf32>
    %85 = vector.broadcast %84 : vector<8x1xf32> to vector<8x8xf32>
    %86 = arith.mulf %81, %85 : vector<8x8xf32>
    %87 = arith.truncf %86 : vector<8x8xf32> to vector<8x8xbf16>
    %cst_46 = arith.constant dense<0.000000e+00> : vector<8x8xf32>
    %88 = tpu.matmul %87, %75, %cst_46 {dimension_numbers = #tpu.dot_dimension_numbers<[1], [0], [0], [1], [0, 0, 1, 1], [], []>} : vector<8x8xbf16>, vector<8x8xbf16>, vector<8x8xf32> -> vector<8x8xf32>
    %89 = vector.extract_strided_slice %39 {offsets = [0, 24], sizes = [8, 8], strides = [1, 1]} : vector<16x64xbf16> to vector<8x8xbf16>
    %90 = vector.extract_strided_slice %39 {offsets = [0, 56], sizes = [8, 8], strides = [1, 1]} : vector<16x64xbf16> to vector<8x8xbf16>
    %91 = vector.extract_strided_slice %40 {offsets = [0, 24], sizes = [8, 8], strides = [1, 1]} : vector<16x32xbf16> to vector<8x8xbf16>
    "tpu.trace_start"() <{level = 10 : i32, message = "sd,td->st"}> : () -> ()
    %cst_47 = arith.constant dense<0.000000e+00> : vector<8x8xf32>
    %92 = tpu.matmul %89, %90, %cst_47 {dimension_numbers = #tpu.dot_dimension_numbers<[1], [1], [0], [0], [0, 0, 1, 0], [], []>} : vector<8x8xbf16>, vector<8x8xbf16>, vector<8x8xf32> -> vector<8x8xf32>
    "tpu.trace_stop"() : () -> ()
    %cst_48 = arith.constant dense<0xFF800000> : vector<8xf32>
    %93 = vector.multi_reduction <maximumf>, %92, %cst_48 [1] : vector<8x8xf32> to vector<8xf32>
    %94 = vector.shape_cast %93 : vector<8xf32> to vector<8x1xf32>
    %95 = vector.broadcast %94 : vector<8x1xf32> to vector<8x8xf32>
    %96 = arith.subf %92, %95 : vector<8x8xf32>
    %97 = math.exp %96 : vector<8x8xf32>
    %cst_49 = arith.constant dense<0.000000e+00> : vector<8xf32>
    %98 = vector.multi_reduction <add>, %97, %cst_49 [1] : vector<8x8xf32> to vector<8xf32>
    %99 = vector.shape_cast %98 : vector<8xf32> to vector<8x1xf32>
    %100 = tpu.reciprocal %99 {approx = true} : vector<8x1xf32> -> vector<8x1xf32>
    %101 = vector.broadcast %100 : vector<8x1xf32> to vector<8x8xf32>
    %102 = arith.mulf %97, %101 : vector<8x8xf32>
    %103 = arith.truncf %102 : vector<8x8xf32> to vector<8x8xbf16>
    %cst_50 = arith.constant dense<0.000000e+00> : vector<8x8xf32>
    %104 = tpu.matmul %103, %91, %cst_50 {dimension_numbers = #tpu.dot_dimension_numbers<[1], [0], [0], [1], [0, 0, 1, 1], [], []>} : vector<8x8xbf16>, vector<8x8xbf16>, vector<8x8xf32> -> vector<8x8xf32>
    %105 = tpu.concatenate %56, %72, %88, %104 in 1 : vector<8x8xf32>, vector<8x8xf32>, vector<8x8xf32>, vector<8x8xf32> -> vector<8x32xf32>
    %106 = vector.extract_strided_slice %39 {offsets = [8, 0], sizes = [8, 8], strides = [1, 1]} : vector<16x64xbf16> to vector<8x8xbf16>
    %107 = vector.extract_strided_slice %39 {offsets = [8, 32], sizes = [8, 8], strides = [1, 1]} : vector<16x64xbf16> to vector<8x8xbf16>
    %108 = vector.extract_strided_slice %40 {offsets = [8, 0], sizes = [8, 8], strides = [1, 1]} : vector<16x32xbf16> to vector<8x8xbf16>
    "tpu.trace_start"() <{level = 10 : i32, message = "sd,td->st"}> : () -> ()
    %cst_51 = arith.constant dense<0.000000e+00> : vector<8x8xf32>
    %109 = tpu.matmul %106, %107, %cst_51 {dimension_numbers = #tpu.dot_dimension_numbers<[1], [1], [0], [0], [0, 0, 1, 0], [], []>} : vector<8x8xbf16>, vector<8x8xbf16>, vector<8x8xf32> -> vector<8x8xf32>
    "tpu.trace_stop"() : () -> ()
    %cst_52 = arith.constant dense<0xFF800000> : vector<8xf32>
    %110 = vector.multi_reduction <maximumf>, %109, %cst_52 [1] : vector<8x8xf32> to vector<8xf32>
    %111 = vector.shape_cast %110 : vector<8xf32> to vector<8x1xf32>
    %112 = vector.broadcast %111 : vector<8x1xf32> to vector<8x8xf32>
    %113 = arith.subf %109, %112 : vector<8x8xf32>
    %114 = math.exp %113 : vector<8x8xf32>
    %cst_53 = arith.constant dense<0.000000e+00> : vector<8xf32>
    %115 = vector.multi_reduction <add>, %114, %cst_53 [1] : vector<8x8xf32> to vector<8xf32>
    %116 = vector.shape_cast %115 : vector<8xf32> to vector<8x1xf32>
    %117 = tpu.reciprocal %116 {approx = true} : vector<8x1xf32> -> vector<8x1xf32>
    %118 = vector.broadcast %117 : vector<8x1xf32> to vector<8x8xf32>
    %119 = arith.mulf %114, %118 : vector<8x8xf32>
    %120 = arith.truncf %119 : vector<8x8xf32> to vector<8x8xbf16>
    %cst_54 = arith.constant dense<0.000000e+00> : vector<8x8xf32>
    %121 = tpu.matmul %120, %108, %cst_54 {dimension_numbers = #tpu.dot_dimension_numbers<[1], [0], [0], [1], [0, 0, 1, 1], [], []>} : vector<8x8xbf16>, vector<8x8xbf16>, vector<8x8xf32> -> vector<8x8xf32>
    %122 = vector.extract_strided_slice %39 {offsets = [8, 8], sizes = [8, 8], strides = [1, 1]} : vector<16x64xbf16> to vector<8x8xbf16>
    %123 = vector.extract_strided_slice %39 {offsets = [8, 40], sizes = [8, 8], strides = [1, 1]} : vector<16x64xbf16> to vector<8x8xbf16>
    %124 = vector.extract_strided_slice %40 {offsets = [8, 8], sizes = [8, 8], strides = [1, 1]} : vector<16x32xbf16> to vector<8x8xbf16>
    "tpu.trace_start"() <{level = 10 : i32, message = "sd,td->st"}> : () -> ()
    %cst_55 = arith.constant dense<0.000000e+00> : vector<8x8xf32>
    %125 = tpu.matmul %122, %123, %cst_55 {dimension_numbers = #tpu.dot_dimension_numbers<[1], [1], [0], [0], [0, 0, 1, 0], [], []>} : vector<8x8xbf16>, vector<8x8xbf16>, vector<8x8xf32> -> vector<8x8xf32>
    "tpu.trace_stop"() : () -> ()
    %cst_56 = arith.constant dense<0xFF800000> : vector<8xf32>
    %126 = vector.multi_reduction <maximumf>, %125, %cst_56 [1] : vector<8x8xf32> to vector<8xf32>
    %127 = vector.shape_cast %126 : vector<8xf32> to vector<8x1xf32>
    %128 = vector.broadcast %127 : vector<8x1xf32> to vector<8x8xf32>
    %129 = arith.subf %125, %128 : vector<8x8xf32>
    %130 = math.exp %129 : vector<8x8xf32>
    %cst_57 = arith.constant dense<0.000000e+00> : vector<8xf32>
    %131 = vector.multi_reduction <add>, %130, %cst_57 [1] : vector<8x8xf32> to vector<8xf32>
    %132 = vector.shape_cast %131 : vector<8xf32> to vector<8x1xf32>
    %133 = tpu.reciprocal %132 {approx = true} : vector<8x1xf32> -> vector<8x1xf32>
    %134 = vector.broadcast %133 : vector<8x1xf32> to vector<8x8xf32>
    %135 = arith.mulf %130, %134 : vector<8x8xf32>
    %136 = arith.truncf %135 : vector<8x8xf32> to vector<8x8xbf16>
    %cst_58 = arith.constant dense<0.000000e+00> : vector<8x8xf32>
    %137 = tpu.matmul %136, %124, %cst_58 {dimension_numbers = #tpu.dot_dimension_numbers<[1], [0], [0], [1], [0, 0, 1, 1], [], []>} : vector<8x8xbf16>, vector<8x8xbf16>, vector<8x8xf32> -> vector<8x8xf32>
    %138 = vector.extract_strided_slice %39 {offsets = [8, 16], sizes = [8, 8], strides = [1, 1]} : vector<16x64xbf16> to vector<8x8xbf16>
    %139 = vector.extract_strided_slice %39 {offsets = [8, 48], sizes = [8, 8], strides = [1, 1]} : vector<16x64xbf16> to vector<8x8xbf16>
    %140 = vector.extract_strided_slice %40 {offsets = [8, 16], sizes = [8, 8], strides = [1, 1]} : vector<16x32xbf16> to vector<8x8xbf16>
    "tpu.trace_start"() <{level = 10 : i32, message = "sd,td->st"}> : () -> ()
    %cst_59 = arith.constant dense<0.000000e+00> : vector<8x8xf32>
    %141 = tpu.matmul %138, %139, %cst_59 {dimension_numbers = #tpu.dot_dimension_numbers<[1], [1], [0], [0], [0, 0, 1, 0], [], []>} : vector<8x8xbf16>, vector<8x8xbf16>, vector<8x8xf32> -> vector<8x8xf32>
    "tpu.trace_stop"() : () -> ()
    %cst_60 = arith.constant dense<0xFF800000> : vector<8xf32>
    %142 = vector.multi_reduction <maximumf>, %141, %cst_60 [1] : vector<8x8xf32> to vector<8xf32>
    %143 = vector.shape_cast %142 : vector<8xf32> to vector<8x1xf32>
    %144 = vector.broadcast %143 : vector<8x1xf32> to vector<8x8xf32>
    %145 = arith.subf %141, %144 : vector<8x8xf32>
    %146 = math.exp %145 : vector<8x8xf32>
    %cst_61 = arith.constant dense<0.000000e+00> : vector<8xf32>
    %147 = vector.multi_reduction <add>, %146, %cst_61 [1] : vector<8x8xf32> to vector<8xf32>
    %148 = vector.shape_cast %147 : vector<8xf32> to vector<8x1xf32>
    %149 = tpu.reciprocal %148 {approx = true} : vector<8x1xf32> -> vector<8x1xf32>
    %150 = vector.broadcast %149 : vector<8x1xf32> to vector<8x8xf32>
    %151 = arith.mulf %146, %150 : vector<8x8xf32>
    %152 = arith.truncf %151 : vector<8x8xf32> to vector<8x8xbf16>
    %cst_62 = arith.constant dense<0.000000e+00> : vector<8x8xf32>
    %153 = tpu.matmul %152, %140, %cst_62 {dimension_numbers = #tpu.dot_dimension_numbers<[1], [0], [0], [1], [0, 0, 1, 1], [], []>} : vector<8x8xbf16>, vector<8x8xbf16>, vector<8x8xf32> -> vector<8x8xf32>
    %154 = vector.extract_strided_slice %39 {offsets = [8, 24], sizes = [8, 8], strides = [1, 1]} : vector<16x64xbf16> to vector<8x8xbf16>
    %155 = vector.extract_strided_slice %39 {offsets = [8, 56], sizes = [8, 8], strides = [1, 1]} : vector<16x64xbf16> to vector<8x8xbf16>
    %156 = vector.extract_strided_slice %40 {offsets = [8, 24], sizes = [8, 8], strides = [1, 1]} : vector<16x32xbf16> to vector<8x8xbf16>
    "tpu.trace_start"() <{level = 10 : i32, message = "sd,td->st"}> : () -> ()
    %cst_63 = arith.constant dense<0.000000e+00> : vector<8x8xf32>
    %157 = tpu.matmul %154, %155, %cst_63 {dimension_numbers = #tpu.dot_dimension_numbers<[1], [1], [0], [0], [0, 0, 1, 0], [], []>} : vector<8x8xbf16>, vector<8x8xbf16>, vector<8x8xf32> -> vector<8x8xf32>
    "tpu.trace_stop"() : () -> ()
    %cst_64 = arith.constant dense<0xFF800000> : vector<8xf32>
    %158 = vector.multi_reduction <maximumf>, %157, %cst_64 [1] : vector<8x8xf32> to vector<8xf32>
    %159 = vector.shape_cast %158 : vector<8xf32> to vector<8x1xf32>
    %160 = vector.broadcast %159 : vector<8x1xf32> to vector<8x8xf32>
    %161 = arith.subf %157, %160 : vector<8x8xf32>
    %162 = math.exp %161 : vector<8x8xf32>
    %cst_65 = arith.constant dense<0.000000e+00> : vector<8xf32>
    %163 = vector.multi_reduction <add>, %162, %cst_65 [1] : vector<8x8xf32> to vector<8xf32>
    %164 = vector.shape_cast %163 : vector<8xf32> to vector<8x1xf32>
    %165 = tpu.reciprocal %164 {approx = true} : vector<8x1xf32> -> vector<8x1xf32>
    %166 = vector.broadcast %165 : vector<8x1xf32> to vector<8x8xf32>
    %167 = arith.mulf %162, %166 : vector<8x8xf32>
    %168 = arith.truncf %167 : vector<8x8xf32> to vector<8x8xbf16>
    %cst_66 = arith.constant dense<0.000000e+00> : vector<8x8xf32>
    %169 = tpu.matmul %168, %156, %cst_66 {dimension_numbers = #tpu.dot_dimension_numbers<[1], [0], [0], [1], [0, 0, 1, 1], [], []>} : vector<8x8xbf16>, vector<8x8xbf16>, vector<8x8xf32> -> vector<8x8xf32>
    %170 = tpu.concatenate %121, %137, %153, %169 in 1 : vector<8x8xf32>, vector<8x8xf32>, vector<8x8xf32>, vector<8x8xf32> -> vector<8x32xf32>
    %171 = tpu.concatenate %105, %170 in 0 : vector<8x32xf32>, vector<8x32xf32> -> vector<16x32xf32>
    %172 = arith.truncf %171 : vector<16x32xf32> to vector<16x32xbf16>
    %cst_67 = arith.constant dense<0.000000e+00> : vector<16x32xf32>
    %173 = tpu.matmul %172, %7, %cst_67 {dimension_numbers = #tpu.dot_dimension_numbers<[1], [0], [0], [1], [0, 0, 1, 1], [], []>} : vector<16x32xbf16>, vector<32x32xbf16>, vector<16x32xf32> -> vector<16x32xf32>
    %174 = vector.broadcast %17 : vector<1x32xf32> to vector<16x32xf32>
    %175 = arith.addf %173, %174 : vector<16x32xf32>
    %176 = arith.addf %0, %175 : vector<16x32xf32>
    %cst_68 = arith.constant dense<0.000000e+00> : vector<16xf32>
    %177 = vector.multi_reduction <add>, %176, %cst_68 [1] : vector<16x32xf32> to vector<16xf32>
    %178 = vector.shape_cast %177 : vector<16xf32> to vector<16x1xf32>
    %cst_69 = arith.constant 3.200000e+01 : f32
    %179 = vector.broadcast %cst_69 : f32 to vector<16x1xf32>
    %180 = arith.divf %178, %179 : vector<16x1xf32>
    %181 = vector.broadcast %180 : vector<16x1xf32> to vector<16x32xf32>
    %182 = arith.subf %176, %181 : vector<16x32xf32>
    %183 = arith.mulf %182, %182 : vector<16x32xf32>
    %cst_70 = arith.constant dense<0.000000e+00> : vector<16xf32>
    %184 = vector.multi_reduction <add>, %183, %cst_70 [1] : vector<16x32xf32> to vector<16xf32>
    %185 = vector.shape_cast %184 : vector<16xf32> to vector<16x1xf32>
    %cst_71 = arith.constant 3.200000e+01 : f32
    %186 = vector.broadcast %cst_71 : f32 to vector<16x1xf32>
    %187 = arith.divf %185, %186 : vector<16x1xf32>
    %188 = vector.broadcast %180 : vector<16x1xf32> to vector<16x32xf32>
    %189 = arith.subf %176, %188 : vector<16x32xf32>
    %cst_72 = arith.constant 9.99999974E-6 : f32
    %190 = vector.broadcast %cst_72 : f32 to vector<16x1xf32>
    %191 = arith.addf %187, %190 : vector<16x1xf32>
    %192 = math.rsqrt %191 : vector<16x1xf32>
    %193 = vector.broadcast %192 : vector<16x1xf32> to vector<16x32xf32>
    %194 = arith.mulf %189, %193 : vector<16x32xf32>
    %195 = vector.broadcast %23 : vector<1x32xf32> to vector<16x32xf32>
    %196 = arith.mulf %194, %195 : vector<16x32xf32>
    %197 = vector.broadcast %25 : vector<1x32xf32> to vector<16x32xf32>
    %198 = arith.addf %196, %197 : vector<16x32xf32>
    %199 = arith.truncf %198 : vector<16x32xf32> to vector<16x32xbf16>
    %cst_73 = arith.constant dense<0.000000e+00> : vector<16x64xf32>
    %200 = tpu.matmul %199, %9, %cst_73 {dimension_numbers = #tpu.dot_dimension_numbers<[1], [0], [0], [1], [0, 0, 1, 1], [], []>} : vector<16x32xbf16>, vector<32x64xbf16>, vector<16x64xf32> -> vector<16x64xf32>
    %201 = vector.broadcast %19 : vector<1x64xf32> to vector<16x64xf32>
    %202 = arith.addf %200, %201 : vector<16x64xf32>
    %cst_74 = arith.constant 0.000000e+00 : f32
    %203 = vector.broadcast %cst_74 : f32 to vector<16x64xf32>
    %204 = arith.maximumf %202, %203 : vector<16x64xf32>
    %205 = arith.truncf %204 : vector<16x64xf32> to vector<16x64xbf16>
    %cst_75 = arith.constant dense<0.000000e+00> : vector<16x32xf32>
    %206 = tpu.matmul %205, %11, %cst_75 {dimension_numbers = #tpu.dot_dimension_numbers<[1], [0], [0], [1], [0, 0, 1, 1], [], []>} : vector<16x64xbf16>, vector<64x32xbf16>, vector<16x32xf32> -> vector<16x32xf32>
    %207 = vector.broadcast %21 : vector<1x32xf32> to vector<16x32xf32>
    %208 = arith.addf %206, %207 : vector<16x32xf32>
    %209 = arith.addf %198, %208 : vector<16x32xf32>
    %cst_76 = arith.constant dense<0.000000e+00> : vector<16xf32>
    %210 = vector.multi_reduction <add>, %209, %cst_76 [1] : vector<16x32xf32> to vector<16xf32>
    %211 = vector.shape_cast %210 : vector<16xf32> to vector<16x1xf32>
    %cst_77 = arith.constant 3.200000e+01 : f32
    %212 = vector.broadcast %cst_77 : f32 to vector<16x1xf32>
    %213 = arith.divf %211, %212 : vector<16x1xf32>
    %214 = vector.broadcast %213 : vector<16x1xf32> to vector<16x32xf32>
    %215 = arith.subf %209, %214 : vector<16x32xf32>
    %216 = arith.mulf %215, %215 : vector<16x32xf32>
    %cst_78 = arith.constant dense<0.000000e+00> : vector<16xf32>
    %217 = vector.multi_reduction <add>, %216, %cst_78 [1] : vector<16x32xf32> to vector<16xf32>
    %218 = vector.shape_cast %217 : vector<16xf32> to vector<16x1xf32>
    %cst_79 = arith.constant 3.200000e+01 : f32
    %219 = vector.broadcast %cst_79 : f32 to vector<16x1xf32>
    %220 = arith.divf %218, %219 : vector<16x1xf32>
    %221 = vector.broadcast %213 : vector<16x1xf32> to vector<16x32xf32>
    %222 = arith.subf %209, %221 : vector<16x32xf32>
    %cst_80 = arith.constant 9.99999974E-6 : f32
    %223 = vector.broadcast %cst_80 : f32 to vector<16x1xf32>
    %224 = arith.addf %220, %223 : vector<16x1xf32>
    %225 = math.rsqrt %224 : vector<16x1xf32>
    %226 = vector.broadcast %225 : vector<16x1xf32> to vector<16x32xf32>
    %227 = arith.mulf %222, %226 : vector<16x32xf32>
    %228 = vector.broadcast %27 : vector<1x32xf32> to vector<16x32xf32>
    %229 = arith.mulf %227, %228 : vector<16x32xf32>
    %230 = vector.broadcast %29 : vector<1x32xf32> to vector<16x32xf32>
    %231 = arith.addf %229, %230 : vector<16x32xf32>
    %c1_81 = arith.constant 1 : index
    %c0_82 = arith.constant 0 : index
    %c0_83 = arith.constant 0 : index
    %232 = vector.load %arg3[%c1_81, %c0_82, %c0_83] : memref<2x160x64xbf16, #tpu.memory_space<vmem>>, vector<1x32x64xbf16>
    %233 = vector.shape_cast %232 : vector<1x32x64xbf16> to vector<32x64xbf16>
    %c1_84 = arith.constant 1 : index
    %c32_85 = arith.constant 32 : index
    %c0_86 = arith.constant 0 : index
    %234 = vector.load %arg3[%c1_84, %c32_85, %c0_86] : memref<2x160x64xbf16, #tpu.memory_space<vmem>>, vector<1x32x32xbf16>
    %235 = vector.shape_cast %234 : vector<1x32x32xbf16> to vector<32x32xbf16>
    %c1_87 = arith.constant 1 : index
    %c32_88 = arith.constant 32 : index
    %c32_89 = arith.constant 32 : index
    %236 = vector.load %arg3[%c1_87, %c32_88, %c32_89] : memref<2x160x64xbf16, #tpu.memory_space<vmem>>, vector<1x32x32xbf16>
    %237 = vector.shape_cast %236 : vector<1x32x32xbf16> to vector<32x32xbf16>
    %c1_90 = arith.constant 1 : index
    %c64_91 = arith.constant 64 : index
    %c0_92 = arith.constant 0 : index
    %238 = vector.load %arg3[%c1_90, %c64_91, %c0_92] : memref<2x160x64xbf16, #tpu.memory_space<vmem>>, vector<1x32x64xbf16>
    %239 = vector.shape_cast %238 : vector<1x32x64xbf16> to vector<32x64xbf16>
    %c1_93 = arith.constant 1 : index
    %c96_94 = arith.constant 96 : index
    %c0_95 = arith.constant 0 : index
    %240 = vector.load %arg3[%c1_93, %c96_94, %c0_95] : memref<2x160x64xbf16, #tpu.memory_space<vmem>>, vector<1x64x32xbf16>
    %241 = vector.shape_cast %240 : vector<1x64x32xbf16> to vector<64x32xbf16>
    %c1_96 = arith.constant 1 : index
    %c0_97 = arith.constant 0 : index
    %c0_98 = arith.constant 0 : index
    %242 = vector.load %arg4[%c1_96, %c0_97, %c0_98] : memref<2x9x64xf32, #tpu.memory_space<vmem>>, vector<1x1x64xf32>
    %243 = vector.shape_cast %242 : vector<1x1x64xf32> to vector<1x64xf32>
    %c1_99 = arith.constant 1 : index
    %c1_100 = arith.constant 1 : index
    %c0_101 = arith.constant 0 : index
    %244 = vector.load %arg4[%c1_99, %c1_100, %c0_101] : memref<2x9x64xf32, #tpu.memory_space<vmem>>, vector<1x1x32xf32>
    %245 = vector.shape_cast %244 : vector<1x1x32xf32> to vector<1x32xf32>
    %c1_102 = arith.constant 1 : index
    %c2_103 = arith.constant 2 : index
    %c0_104 = arith.constant 0 : index
    %246 = vector.load %arg4[%c1_102, %c2_103, %c0_104] : memref<2x9x64xf32, #tpu.memory_space<vmem>>, vector<1x1x32xf32>
    %247 = vector.shape_cast %246 : vector<1x1x32xf32> to vector<1x32xf32>
    %c1_105 = arith.constant 1 : index
    %c3_106 = arith.constant 3 : index
    %c0_107 = arith.constant 0 : index
    %248 = vector.load %arg4[%c1_105, %c3_106, %c0_107] : memref<2x9x64xf32, #tpu.memory_space<vmem>>, vector<1x1x64xf32>
    %249 = vector.shape_cast %248 : vector<1x1x64xf32> to vector<1x64xf32>
    %c1_108 = arith.constant 1 : index
    %c4_109 = arith.constant 4 : index
    %c0_110 = arith.constant 0 : index
    %250 = vector.load %arg4[%c1_108, %c4_109, %c0_110] : memref<2x9x64xf32, #tpu.memory_space<vmem>>, vector<1x1x32xf32>
    %251 = vector.shape_cast %250 : vector<1x1x32xf32> to vector<1x32xf32>
    %c1_111 = arith.constant 1 : index
    %c5_112 = arith.constant 5 : index
    %c0_113 = arith.constant 0 : index
    %252 = vector.load %arg4[%c1_111, %c5_112, %c0_113] : memref<2x9x64xf32, #tpu.memory_space<vmem>>, vector<1x1x32xf32>
    %253 = vector.shape_cast %252 : vector<1x1x32xf32> to vector<1x32xf32>
    %c1_114 = arith.constant 1 : index
    %c6_115 = arith.constant 6 : index
    %c0_116 = arith.constant 0 : index
    %254 = vector.load %arg4[%c1_114, %c6_115, %c0_116] : memref<2x9x64xf32, #tpu.memory_space<vmem>>, vector<1x1x32xf32>
    %255 = vector.shape_cast %254 : vector<1x1x32xf32> to vector<1x32xf32>
    %c1_117 = arith.constant 1 : index
    %c7_118 = arith.constant 7 : index
    %c0_119 = arith.constant 0 : index
    %256 = vector.load %arg4[%c1_117, %c7_118, %c0_119] : memref<2x9x64xf32, #tpu.memory_space<vmem>>, vector<1x1x32xf32>
    %257 = vector.shape_cast %256 : vector<1x1x32xf32> to vector<1x32xf32>
    %c1_120 = arith.constant 1 : index
    %c8_121 = arith.constant 8 : index
    %c0_122 = arith.constant 0 : index
    %258 = vector.load %arg4[%c1_120, %c8_121, %c0_122] : memref<2x9x64xf32, #tpu.memory_space<vmem>>, vector<1x1x32xf32>
    %259 = vector.shape_cast %258 : vector<1x1x32xf32> to vector<1x32xf32>
    %260 = arith.addf %231, %1 : vector<16x32xf32>
    %261 = arith.truncf %260 : vector<16x32xf32> to vector<16x32xbf16>
    %262 = arith.truncf %231 : vector<16x32xf32> to vector<16x32xbf16>
    %cst_123 = arith.constant dense<0.000000e+00> : vector<16x64xf32>
    %263 = tpu.matmul %261, %233, %cst_123 {dimension_numbers = #tpu.dot_dimension_numbers<[1], [0], [0], [1], [0, 0, 1, 1], [], []>} : vector<16x32xbf16>, vector<32x64xbf16>, vector<16x64xf32> -> vector<16x64xf32>
    %264 = vector.broadcast %243 : vector<1x64xf32> to vector<16x64xf32>
    %265 = arith.addf %263, %264 : vector<16x64xf32>
    %cst_124 = arith.constant dense<0.000000e+00> : vector<16x32xf32>
    %266 = tpu.matmul %262, %235, %cst_124 {dimension_numbers = #tpu.dot_dimension_numbers<[1], [0], [0], [1], [0, 0, 1, 1], [], []>} : vector<16x32xbf16>, vector<32x32xbf16>, vector<16x32xf32> -> vector<16x32xf32>
    %267 = vector.broadcast %245 : vector<1x32xf32> to vector<16x32xf32>
    %268 = arith.addf %266, %267 : vector<16x32xf32>
    %269 = arith.truncf %265 : vector<16x64xf32> to vector<16x64xbf16>
    %270 = arith.truncf %268 : vector<16x32xf32> to vector<16x32xbf16>
    %271 = vector.extract_strided_slice %269 {offsets = [0, 0], sizes = [8, 8], strides = [1, 1]} : vector<16x64xbf16> to vector<8x8xbf16>
    %272 = vector.extract_strided_slice %269 {offsets = [0, 32], sizes = [8, 8], strides = [1, 1]} : vector<16x64xbf16> to vector<8x8xbf16>
    %273 = vector.extract_strided_slice %270 {offsets = [0, 0], sizes = [8, 8], strides = [1, 1]} : vector<16x32xbf16> to vector<8x8xbf16>
    "tpu.trace_start"() <{level = 10 : i32, message = "sd,td->st"}> : () -> ()
    %cst_125 = arith.constant dense<0.000000e+00> : vector<8x8xf32>
    %274 = tpu.matmul %271, %272, %cst_125 {dimension_numbers = #tpu.dot_dimension_numbers<[1], [1], [0], [0], [0, 0, 1, 0], [], []>} : vector<8x8xbf16>, vector<8x8xbf16>, vector<8x8xf32> -> vector<8x8xf32>
    "tpu.trace_stop"() : () -> ()
    %cst_126 = arith.constant dense<0xFF800000> : vector<8xf32>
    %275 = vector.multi_reduction <maximumf>, %274, %cst_126 [1] : vector<8x8xf32> to vector<8xf32>
    %276 = vector.shape_cast %275 : vector<8xf32> to vector<8x1xf32>
    %277 = vector.broadcast %276 : vector<8x1xf32> to vector<8x8xf32>
    %278 = arith.subf %274, %277 : vector<8x8xf32>
    %279 = math.exp %278 : vector<8x8xf32>
    %cst_127 = arith.constant dense<0.000000e+00> : vector<8xf32>
    %280 = vector.multi_reduction <add>, %279, %cst_127 [1] : vector<8x8xf32> to vector<8xf32>
    %281 = vector.shape_cast %280 : vector<8xf32> to vector<8x1xf32>
    %282 = tpu.reciprocal %281 {approx = true} : vector<8x1xf32> -> vector<8x1xf32>
    %283 = vector.broadcast %282 : vector<8x1xf32> to vector<8x8xf32>
    %284 = arith.mulf %279, %283 : vector<8x8xf32>
    %285 = arith.truncf %284 : vector<8x8xf32> to vector<8x8xbf16>
    %cst_128 = arith.constant dense<0.000000e+00> : vector<8x8xf32>
    %286 = tpu.matmul %285, %273, %cst_128 {dimension_numbers = #tpu.dot_dimension_numbers<[1], [0], [0], [1], [0, 0, 1, 1], [], []>} : vector<8x8xbf16>, vector<8x8xbf16>, vector<8x8xf32> -> vector<8x8xf32>
    %287 = vector.extract_strided_slice %269 {offsets = [0, 8], sizes = [8, 8], strides = [1, 1]} : vector<16x64xbf16> to vector<8x8xbf16>
    %288 = vector.extract_strided_slice %269 {offsets = [0, 40], sizes = [8, 8], strides = [1, 1]} : vector<16x64xbf16> to vector<8x8xbf16>
    %289 = vector.extract_strided_slice %270 {offsets = [0, 8], sizes = [8, 8], strides = [1, 1]} : vector<16x32xbf16> to vector<8x8xbf16>
    "tpu.trace_start"() <{level = 10 : i32, message = "sd,td->st"}> : () -> ()
    %cst_129 = arith.constant dense<0.000000e+00> : vector<8x8xf32>
    %290 = tpu.matmul %287, %288, %cst_129 {dimension_numbers = #tpu.dot_dimension_numbers<[1], [1], [0], [0], [0, 0, 1, 0], [], []>} : vector<8x8xbf16>, vector<8x8xbf16>, vector<8x8xf32> -> vector<8x8xf32>
    "tpu.trace_stop"() : () -> ()
    %cst_130 = arith.constant dense<0xFF800000> : vector<8xf32>
    %291 = vector.multi_reduction <maximumf>, %290, %cst_130 [1] : vector<8x8xf32> to vector<8xf32>
    %292 = vector.shape_cast %291 : vector<8xf32> to vector<8x1xf32>
    %293 = vector.broadcast %292 : vector<8x1xf32> to vector<8x8xf32>
    %294 = arith.subf %290, %293 : vector<8x8xf32>
    %295 = math.exp %294 : vector<8x8xf32>
    %cst_131 = arith.constant dense<0.000000e+00> : vector<8xf32>
    %296 = vector.multi_reduction <add>, %295, %cst_131 [1] : vector<8x8xf32> to vector<8xf32>
    %297 = vector.shape_cast %296 : vector<8xf32> to vector<8x1xf32>
    %298 = tpu.reciprocal %297 {approx = true} : vector<8x1xf32> -> vector<8x1xf32>
    %299 = vector.broadcast %298 : vector<8x1xf32> to vector<8x8xf32>
    %300 = arith.mulf %295, %299 : vector<8x8xf32>
    %301 = arith.truncf %300 : vector<8x8xf32> to vector<8x8xbf16>
    %cst_132 = arith.constant dense<0.000000e+00> : vector<8x8xf32>
    %302 = tpu.matmul %301, %289, %cst_132 {dimension_numbers = #tpu.dot_dimension_numbers<[1], [0], [0], [1], [0, 0, 1, 1], [], []>} : vector<8x8xbf16>, vector<8x8xbf16>, vector<8x8xf32> -> vector<8x8xf32>
    %303 = vector.extract_strided_slice %269 {offsets = [0, 16], sizes = [8, 8], strides = [1, 1]} : vector<16x64xbf16> to vector<8x8xbf16>
    %304 = vector.extract_strided_slice %269 {offsets = [0, 48], sizes = [8, 8], strides = [1, 1]} : vector<16x64xbf16> to vector<8x8xbf16>
    %305 = vector.extract_strided_slice %270 {offsets = [0, 16], sizes = [8, 8], strides = [1, 1]} : vector<16x32xbf16> to vector<8x8xbf16>
    "tpu.trace_start"() <{level = 10 : i32, message = "sd,td->st"}> : () -> ()
    %cst_133 = arith.constant dense<0.000000e+00> : vector<8x8xf32>
    %306 = tpu.matmul %303, %304, %cst_133 {dimension_numbers = #tpu.dot_dimension_numbers<[1], [1], [0], [0], [0, 0, 1, 0], [], []>} : vector<8x8xbf16>, vector<8x8xbf16>, vector<8x8xf32> -> vector<8x8xf32>
    "tpu.trace_stop"() : () -> ()
    %cst_134 = arith.constant dense<0xFF800000> : vector<8xf32>
    %307 = vector.multi_reduction <maximumf>, %306, %cst_134 [1] : vector<8x8xf32> to vector<8xf32>
    %308 = vector.shape_cast %307 : vector<8xf32> to vector<8x1xf32>
    %309 = vector.broadcast %308 : vector<8x1xf32> to vector<8x8xf32>
    %310 = arith.subf %306, %309 : vector<8x8xf32>
    %311 = math.exp %310 : vector<8x8xf32>
    %cst_135 = arith.constant dense<0.000000e+00> : vector<8xf32>
    %312 = vector.multi_reduction <add>, %311, %cst_135 [1] : vector<8x8xf32> to vector<8xf32>
    %313 = vector.shape_cast %312 : vector<8xf32> to vector<8x1xf32>
    %314 = tpu.reciprocal %313 {approx = true} : vector<8x1xf32> -> vector<8x1xf32>
    %315 = vector.broadcast %314 : vector<8x1xf32> to vector<8x8xf32>
    %316 = arith.mulf %311, %315 : vector<8x8xf32>
    %317 = arith.truncf %316 : vector<8x8xf32> to vector<8x8xbf16>
    %cst_136 = arith.constant dense<0.000000e+00> : vector<8x8xf32>
    %318 = tpu.matmul %317, %305, %cst_136 {dimension_numbers = #tpu.dot_dimension_numbers<[1], [0], [0], [1], [0, 0, 1, 1], [], []>} : vector<8x8xbf16>, vector<8x8xbf16>, vector<8x8xf32> -> vector<8x8xf32>
    %319 = vector.extract_strided_slice %269 {offsets = [0, 24], sizes = [8, 8], strides = [1, 1]} : vector<16x64xbf16> to vector<8x8xbf16>
    %320 = vector.extract_strided_slice %269 {offsets = [0, 56], sizes = [8, 8], strides = [1, 1]} : vector<16x64xbf16> to vector<8x8xbf16>
    %321 = vector.extract_strided_slice %270 {offsets = [0, 24], sizes = [8, 8], strides = [1, 1]} : vector<16x32xbf16> to vector<8x8xbf16>
    "tpu.trace_start"() <{level = 10 : i32, message = "sd,td->st"}> : () -> ()
    %cst_137 = arith.constant dense<0.000000e+00> : vector<8x8xf32>
    %322 = tpu.matmul %319, %320, %cst_137 {dimension_numbers = #tpu.dot_dimension_numbers<[1], [1], [0], [0], [0, 0, 1, 0], [], []>} : vector<8x8xbf16>, vector<8x8xbf16>, vector<8x8xf32> -> vector<8x8xf32>
    "tpu.trace_stop"() : () -> ()
    %cst_138 = arith.constant dense<0xFF800000> : vector<8xf32>
    %323 = vector.multi_reduction <maximumf>, %322, %cst_138 [1] : vector<8x8xf32> to vector<8xf32>
    %324 = vector.shape_cast %323 : vector<8xf32> to vector<8x1xf32>
    %325 = vector.broadcast %324 : vector<8x1xf32> to vector<8x8xf32>
    %326 = arith.subf %322, %325 : vector<8x8xf32>
    %327 = math.exp %326 : vector<8x8xf32>
    %cst_139 = arith.constant dense<0.000000e+00> : vector<8xf32>
    %328 = vector.multi_reduction <add>, %327, %cst_139 [1] : vector<8x8xf32> to vector<8xf32>
    %329 = vector.shape_cast %328 : vector<8xf32> to vector<8x1xf32>
    %330 = tpu.reciprocal %329 {approx = true} : vector<8x1xf32> -> vector<8x1xf32>
    %331 = vector.broadcast %330 : vector<8x1xf32> to vector<8x8xf32>
    %332 = arith.mulf %327, %331 : vector<8x8xf32>
    %333 = arith.truncf %332 : vector<8x8xf32> to vector<8x8xbf16>
    %cst_140 = arith.constant dense<0.000000e+00> : vector<8x8xf32>
    %334 = tpu.matmul %333, %321, %cst_140 {dimension_numbers = #tpu.dot_dimension_numbers<[1], [0], [0], [1], [0, 0, 1, 1], [], []>} : vector<8x8xbf16>, vector<8x8xbf16>, vector<8x8xf32> -> vector<8x8xf32>
    %335 = tpu.concatenate %286, %302, %318, %334 in 1 : vector<8x8xf32>, vector<8x8xf32>, vector<8x8xf32>, vector<8x8xf32> -> vector<8x32xf32>
    %336 = vector.extract_strided_slice %269 {offsets = [8, 0], sizes = [8, 8], strides = [1, 1]} : vector<16x64xbf16> to vector<8x8xbf16>
    %337 = vector.extract_strided_slice %269 {offsets = [8, 32], sizes = [8, 8], strides = [1, 1]} : vector<16x64xbf16> to vector<8x8xbf16>
    %338 = vector.extract_strided_slice %270 {offsets = [8, 0], sizes = [8, 8], strides = [1, 1]} : vector<16x32xbf16> to vector<8x8xbf16>
    "tpu.trace_start"() <{level = 10 : i32, message = "sd,td->st"}> : () -> ()
    %cst_141 = arith.constant dense<0.000000e+00> : vector<8x8xf32>
    %339 = tpu.matmul %336, %337, %cst_141 {dimension_numbers = #tpu.dot_dimension_numbers<[1], [1], [0], [0], [0, 0, 1, 0], [], []>} : vector<8x8xbf16>, vector<8x8xbf16>, vector<8x8xf32> -> vector<8x8xf32>
    "tpu.trace_stop"() : () -> ()
    %cst_142 = arith.constant dense<0xFF800000> : vector<8xf32>
    %340 = vector.multi_reduction <maximumf>, %339, %cst_142 [1] : vector<8x8xf32> to vector<8xf32>
    %341 = vector.shape_cast %340 : vector<8xf32> to vector<8x1xf32>
    %342 = vector.broadcast %341 : vector<8x1xf32> to vector<8x8xf32>
    %343 = arith.subf %339, %342 : vector<8x8xf32>
    %344 = math.exp %343 : vector<8x8xf32>
    %cst_143 = arith.constant dense<0.000000e+00> : vector<8xf32>
    %345 = vector.multi_reduction <add>, %344, %cst_143 [1] : vector<8x8xf32> to vector<8xf32>
    %346 = vector.shape_cast %345 : vector<8xf32> to vector<8x1xf32>
    %347 = tpu.reciprocal %346 {approx = true} : vector<8x1xf32> -> vector<8x1xf32>
    %348 = vector.broadcast %347 : vector<8x1xf32> to vector<8x8xf32>
    %349 = arith.mulf %344, %348 : vector<8x8xf32>
    %350 = arith.truncf %349 : vector<8x8xf32> to vector<8x8xbf16>
    %cst_144 = arith.constant dense<0.000000e+00> : vector<8x8xf32>
    %351 = tpu.matmul %350, %338, %cst_144 {dimension_numbers = #tpu.dot_dimension_numbers<[1], [0], [0], [1], [0, 0, 1, 1], [], []>} : vector<8x8xbf16>, vector<8x8xbf16>, vector<8x8xf32> -> vector<8x8xf32>
    %352 = vector.extract_strided_slice %269 {offsets = [8, 8], sizes = [8, 8], strides = [1, 1]} : vector<16x64xbf16> to vector<8x8xbf16>
    %353 = vector.extract_strided_slice %269 {offsets = [8, 40], sizes = [8, 8], strides = [1, 1]} : vector<16x64xbf16> to vector<8x8xbf16>
    %354 = vector.extract_strided_slice %270 {offsets = [8, 8], sizes = [8, 8], strides = [1, 1]} : vector<16x32xbf16> to vector<8x8xbf16>
    "tpu.trace_start"() <{level = 10 : i32, message = "sd,td->st"}> : () -> ()
    %cst_145 = arith.constant dense<0.000000e+00> : vector<8x8xf32>
    %355 = tpu.matmul %352, %353, %cst_145 {dimension_numbers = #tpu.dot_dimension_numbers<[1], [1], [0], [0], [0, 0, 1, 0], [], []>} : vector<8x8xbf16>, vector<8x8xbf16>, vector<8x8xf32> -> vector<8x8xf32>
    "tpu.trace_stop"() : () -> ()
    %cst_146 = arith.constant dense<0xFF800000> : vector<8xf32>
    %356 = vector.multi_reduction <maximumf>, %355, %cst_146 [1] : vector<8x8xf32> to vector<8xf32>
    %357 = vector.shape_cast %356 : vector<8xf32> to vector<8x1xf32>
    %358 = vector.broadcast %357 : vector<8x1xf32> to vector<8x8xf32>
    %359 = arith.subf %355, %358 : vector<8x8xf32>
    %360 = math.exp %359 : vector<8x8xf32>
    %cst_147 = arith.constant dense<0.000000e+00> : vector<8xf32>
    %361 = vector.multi_reduction <add>, %360, %cst_147 [1] : vector<8x8xf32> to vector<8xf32>
    %362 = vector.shape_cast %361 : vector<8xf32> to vector<8x1xf32>
    %363 = tpu.reciprocal %362 {approx = true} : vector<8x1xf32> -> vector<8x1xf32>
    %364 = vector.broadcast %363 : vector<8x1xf32> to vector<8x8xf32>
    %365 = arith.mulf %360, %364 : vector<8x8xf32>
    %366 = arith.truncf %365 : vector<8x8xf32> to vector<8x8xbf16>
    %cst_148 = arith.constant dense<0.000000e+00> : vector<8x8xf32>
    %367 = tpu.matmul %366, %354, %cst_148 {dimension_numbers = #tpu.dot_dimension_numbers<[1], [0], [0], [1], [0, 0, 1, 1], [], []>} : vector<8x8xbf16>, vector<8x8xbf16>, vector<8x8xf32> -> vector<8x8xf32>
    %368 = vector.extract_strided_slice %269 {offsets = [8, 16], sizes = [8, 8], strides = [1, 1]} : vector<16x64xbf16> to vector<8x8xbf16>
    %369 = vector.extract_strided_slice %269 {offsets = [8, 48], sizes = [8, 8], strides = [1, 1]} : vector<16x64xbf16> to vector<8x8xbf16>
    %370 = vector.extract_strided_slice %270 {offsets = [8, 16], sizes = [8, 8], strides = [1, 1]} : vector<16x32xbf16> to vector<8x8xbf16>
    "tpu.trace_start"() <{level = 10 : i32, message = "sd,td->st"}> : () -> ()
    %cst_149 = arith.constant dense<0.000000e+00> : vector<8x8xf32>
    %371 = tpu.matmul %368, %369, %cst_149 {dimension_numbers = #tpu.dot_dimension_numbers<[1], [1], [0], [0], [0, 0, 1, 0], [], []>} : vector<8x8xbf16>, vector<8x8xbf16>, vector<8x8xf32> -> vector<8x8xf32>
    "tpu.trace_stop"() : () -> ()
    %cst_150 = arith.constant dense<0xFF800000> : vector<8xf32>
    %372 = vector.multi_reduction <maximumf>, %371, %cst_150 [1] : vector<8x8xf32> to vector<8xf32>
    %373 = vector.shape_cast %372 : vector<8xf32> to vector<8x1xf32>
    %374 = vector.broadcast %373 : vector<8x1xf32> to vector<8x8xf32>
    %375 = arith.subf %371, %374 : vector<8x8xf32>
    %376 = math.exp %375 : vector<8x8xf32>
    %cst_151 = arith.constant dense<0.000000e+00> : vector<8xf32>
    %377 = vector.multi_reduction <add>, %376, %cst_151 [1] : vector<8x8xf32> to vector<8xf32>
    %378 = vector.shape_cast %377 : vector<8xf32> to vector<8x1xf32>
    %379 = tpu.reciprocal %378 {approx = true} : vector<8x1xf32> -> vector<8x1xf32>
    %380 = vector.broadcast %379 : vector<8x1xf32> to vector<8x8xf32>
    %381 = arith.mulf %376, %380 : vector<8x8xf32>
    %382 = arith.truncf %381 : vector<8x8xf32> to vector<8x8xbf16>
    %cst_152 = arith.constant dense<0.000000e+00> : vector<8x8xf32>
    %383 = tpu.matmul %382, %370, %cst_152 {dimension_numbers = #tpu.dot_dimension_numbers<[1], [0], [0], [1], [0, 0, 1, 1], [], []>} : vector<8x8xbf16>, vector<8x8xbf16>, vector<8x8xf32> -> vector<8x8xf32>
    %384 = vector.extract_strided_slice %269 {offsets = [8, 24], sizes = [8, 8], strides = [1, 1]} : vector<16x64xbf16> to vector<8x8xbf16>
    %385 = vector.extract_strided_slice %269 {offsets = [8, 56], sizes = [8, 8], strides = [1, 1]} : vector<16x64xbf16> to vector<8x8xbf16>
    %386 = vector.extract_strided_slice %270 {offsets = [8, 24], sizes = [8, 8], strides = [1, 1]} : vector<16x32xbf16> to vector<8x8xbf16>
    "tpu.trace_start"() <{level = 10 : i32, message = "sd,td->st"}> : () -> ()
    %cst_153 = arith.constant dense<0.000000e+00> : vector<8x8xf32>
    %387 = tpu.matmul %384, %385, %cst_153 {dimension_numbers = #tpu.dot_dimension_numbers<[1], [1], [0], [0], [0, 0, 1, 0], [], []>} : vector<8x8xbf16>, vector<8x8xbf16>, vector<8x8xf32> -> vector<8x8xf32>
    "tpu.trace_stop"() : () -> ()
    %cst_154 = arith.constant dense<0xFF800000> : vector<8xf32>
    %388 = vector.multi_reduction <maximumf>, %387, %cst_154 [1] : vector<8x8xf32> to vector<8xf32>
    %389 = vector.shape_cast %388 : vector<8xf32> to vector<8x1xf32>
    %390 = vector.broadcast %389 : vector<8x1xf32> to vector<8x8xf32>
    %391 = arith.subf %387, %390 : vector<8x8xf32>
    %392 = math.exp %391 : vector<8x8xf32>
    %cst_155 = arith.constant dense<0.000000e+00> : vector<8xf32>
    %393 = vector.multi_reduction <add>, %392, %cst_155 [1] : vector<8x8xf32> to vector<8xf32>
    %394 = vector.shape_cast %393 : vector<8xf32> to vector<8x1xf32>
    %395 = tpu.reciprocal %394 {approx = true} : vector<8x1xf32> -> vector<8x1xf32>
    %396 = vector.broadcast %395 : vector<8x1xf32> to vector<8x8xf32>
    %397 = arith.mulf %392, %396 : vector<8x8xf32>
    %398 = arith.truncf %397 : vector<8x8xf32> to vector<8x8xbf16>
    %cst_156 = arith.constant dense<0.000000e+00> : vector<8x8xf32>
    %399 = tpu.matmul %398, %386, %cst_156 {dimension_numbers = #tpu.dot_dimension_numbers<[1], [0], [0], [1], [0, 0, 1, 1], [], []>} : vector<8x8xbf16>, vector<8x8xbf16>, vector<8x8xf32> -> vector<8x8xf32>
    %400 = tpu.concatenate %351, %367, %383, %399 in 1 : vector<8x8xf32>, vector<8x8xf32>, vector<8x8xf32>, vector<8x8xf32> -> vector<8x32xf32>
    %401 = tpu.concatenate %335, %400 in 0 : vector<8x32xf32>, vector<8x32xf32> -> vector<16x32xf32>
    %402 = arith.truncf %401 : vector<16x32xf32> to vector<16x32xbf16>
    %cst_157 = arith.constant dense<0.000000e+00> : vector<16x32xf32>
    %403 = tpu.matmul %402, %237, %cst_157 {dimension_numbers = #tpu.dot_dimension_numbers<[1], [0], [0], [1], [0, 0, 1, 1], [], []>} : vector<16x32xbf16>, vector<32x32xbf16>, vector<16x32xf32> -> vector<16x32xf32>
    %404 = vector.broadcast %247 : vector<1x32xf32> to vector<16x32xf32>
    %405 = arith.addf %403, %404 : vector<16x32xf32>
    %406 = arith.addf %231, %405 : vector<16x32xf32>
    %cst_158 = arith.constant dense<0.000000e+00> : vector<16xf32>
    %407 = vector.multi_reduction <add>, %406, %cst_158 [1] : vector<16x32xf32> to vector<16xf32>
    %408 = vector.shape_cast %407 : vector<16xf32> to vector<16x1xf32>
    %cst_159 = arith.constant 3.200000e+01 : f32
    %409 = vector.broadcast %cst_159 : f32 to vector<16x1xf32>
    %410 = arith.divf %408, %409 : vector<16x1xf32>
    %411 = vector.broadcast %410 : vector<16x1xf32> to vector<16x32xf32>
    %412 = arith.subf %406, %411 : vector<16x32xf32>
    %413 = arith.mulf %412, %412 : vector<16x32xf32>
    %cst_160 = arith.constant dense<0.000000e+00> : vector<16xf32>
    %414 = vector.multi_reduction <add>, %413, %cst_160 [1] : vector<16x32xf32> to vector<16xf32>
    %415 = vector.shape_cast %414 : vector<16xf32> to vector<16x1xf32>
    %cst_161 = arith.constant 3.200000e+01 : f32
    %416 = vector.broadcast %cst_161 : f32 to vector<16x1xf32>
    %417 = arith.divf %415, %416 : vector<16x1xf32>
    %418 = vector.broadcast %410 : vector<16x1xf32> to vector<16x32xf32>
    %419 = arith.subf %406, %418 : vector<16x32xf32>
    %cst_162 = arith.constant 9.99999974E-6 : f32
    %420 = vector.broadcast %cst_162 : f32 to vector<16x1xf32>
    %421 = arith.addf %417, %420 : vector<16x1xf32>
    %422 = math.rsqrt %421 : vector<16x1xf32>
    %423 = vector.broadcast %422 : vector<16x1xf32> to vector<16x32xf32>
    %424 = arith.mulf %419, %423 : vector<16x32xf32>
    %425 = vector.broadcast %253 : vector<1x32xf32> to vector<16x32xf32>
    %426 = arith.mulf %424, %425 : vector<16x32xf32>
    %427 = vector.broadcast %255 : vector<1x32xf32> to vector<16x32xf32>
    %428 = arith.addf %426, %427 : vector<16x32xf32>
    %429 = arith.truncf %428 : vector<16x32xf32> to vector<16x32xbf16>
    %cst_163 = arith.constant dense<0.000000e+00> : vector<16x64xf32>
    %430 = tpu.matmul %429, %239, %cst_163 {dimension_numbers = #tpu.dot_dimension_numbers<[1], [0], [0], [1], [0, 0, 1, 1], [], []>} : vector<16x32xbf16>, vector<32x64xbf16>, vector<16x64xf32> -> vector<16x64xf32>
    %431 = vector.broadcast %249 : vector<1x64xf32> to vector<16x64xf32>
    %432 = arith.addf %430, %431 : vector<16x64xf32>
    %cst_164 = arith.constant 0.000000e+00 : f32
    %433 = vector.broadcast %cst_164 : f32 to vector<16x64xf32>
    %434 = arith.maximumf %432, %433 : vector<16x64xf32>
    %435 = arith.truncf %434 : vector<16x64xf32> to vector<16x64xbf16>
    %cst_165 = arith.constant dense<0.000000e+00> : vector<16x32xf32>
    %436 = tpu.matmul %435, %241, %cst_165 {dimension_numbers = #tpu.dot_dimension_numbers<[1], [0], [0], [1], [0, 0, 1, 1], [], []>} : vector<16x64xbf16>, vector<64x32xbf16>, vector<16x32xf32> -> vector<16x32xf32>
    %437 = vector.broadcast %251 : vector<1x32xf32> to vector<16x32xf32>
    %438 = arith.addf %436, %437 : vector<16x32xf32>
    %439 = arith.addf %428, %438 : vector<16x32xf32>
    %cst_166 = arith.constant dense<0.000000e+00> : vector<16xf32>
    %440 = vector.multi_reduction <add>, %439, %cst_166 [1] : vector<16x32xf32> to vector<16xf32>
    %441 = vector.shape_cast %440 : vector<16xf32> to vector<16x1xf32>
    %cst_167 = arith.constant 3.200000e+01 : f32
    %442 = vector.broadcast %cst_167 : f32 to vector<16x1xf32>
    %443 = arith.divf %441, %442 : vector<16x1xf32>
    %444 = vector.broadcast %443 : vector<16x1xf32> to vector<16x32xf32>
    %445 = arith.subf %439, %444 : vector<16x32xf32>
    %446 = arith.mulf %445, %445 : vector<16x32xf32>
    %cst_168 = arith.constant dense<0.000000e+00> : vector<16xf32>
    %447 = vector.multi_reduction <add>, %446, %cst_168 [1] : vector<16x32xf32> to vector<16xf32>
    %448 = vector.shape_cast %447 : vector<16xf32> to vector<16x1xf32>
    %cst_169 = arith.constant 3.200000e+01 : f32
    %449 = vector.broadcast %cst_169 : f32 to vector<16x1xf32>
    %450 = arith.divf %448, %449 : vector<16x1xf32>
    %451 = vector.broadcast %443 : vector<16x1xf32> to vector<16x32xf32>
    %452 = arith.subf %439, %451 : vector<16x32xf32>
    %cst_170 = arith.constant 9.99999974E-6 : f32
    %453 = vector.broadcast %cst_170 : f32 to vector<16x1xf32>
    %454 = arith.addf %450, %453 : vector<16x1xf32>
    %455 = math.rsqrt %454 : vector<16x1xf32>
    %456 = vector.broadcast %455 : vector<16x1xf32> to vector<16x32xf32>
    %457 = arith.mulf %452, %456 : vector<16x32xf32>
    %458 = vector.broadcast %257 : vector<1x32xf32> to vector<16x32xf32>
    %459 = arith.mulf %457, %458 : vector<16x32xf32>
    %460 = vector.broadcast %259 : vector<1x32xf32> to vector<16x32xf32>
    %461 = arith.addf %459, %460 : vector<16x32xf32>
    %c0_171 = arith.constant 0 : index
    %c0_172 = arith.constant 0 : index
    %462 = vector.load %arg5[%c0_171, %c0_172] : memref<16x32xf32, #tpu.memory_space<vmem>>, vector<16x32xf32>
    tpu.vector_store %arg5[%c0_171, %c0_172], %461 {strides = array<i32>} : memref<16x32xf32, #tpu.memory_space<vmem>>, vector<16x32xf32>,
    return
  }
  func.func @transform_0(%arg0: i32) -> (i32, i32) {
    %c0_i32 = arith.constant 0 : i32
    %c0_i32_0 = arith.constant 0 : i32
    %c0_i32_1 = arith.constant 0 : i32
    return %c0_i32, %c0_i32_0 : i32, i32
  }
  func.func @transform_1(%arg0: i32) -> (i32, i32) {
    %c0_i32 = arith.constant 0 : i32
    %c0_i32_0 = arith.constant 0 : i32
    %c0_i32_1 = arith.constant 0 : i32
    return %c0_i32, %c0_i32_0 : i32, i32
  }
  func.func @transform_2(%arg0: i32) -> (i32, i32, i32) {
    %c0_i32 = arith.constant 0 : i32
    %c0_i32_0 = arith.constant 0 : i32
    %c0_i32_1 = arith.constant 0 : i32
    %c0_i32_2 = arith.constant 0 : i32
    return %c0_i32, %c0_i32_0, %c0_i32_1 : i32, i32, i32
  }
  func.func @transform_3(%arg0: i32) -> (i32, i32, i32) {
    %c0_i32 = arith.constant 0 : i32
    %c0_i32_0 = arith.constant 0 : i32
    %c0_i32_1 = arith.constant 0 : i32
    %c0_i32_2 = arith.constant 0 : i32
    return %c0_i32, %c0_i32_0, %c0_i32_1 : i32, i32, i32
  }
  func.func @transform_4(%arg0: i32) -> (i32, i32) {
    %c0_i32 = arith.constant 0 : i32
    %c0_i32_0 = arith.constant 0 : i32
    %c0_i32_1 = arith.constant 0 : i32
    return %c0_i32, %c0_i32_0 : i32, i32
  }
}

</mosaic_0001>

<bundles_post_ra>
// kernel: transformer_encoder.1
= control target key start
LH: loop header
LB: loop body
LE: loop exit
PB: predicated region body
PF: predicated region fallthrough
CT: control target
= control target key end

     0   :  { %v3332_v0 = vmov 0.0   ;;  %vm3333_vm0 = vmmov 0   ;;  %vm71_vm1 = vcmask 261120   ;;  %s3334_s28 = smov 120   ;;  %s3335_s29 = smov 96   ;;  %vm181_vm2 = vcmask 64512   ;;  %s3953_s2 = inlined_call_operand.vmem [shape: bf16[2,160,64], index: 2, kind: input, shape index: {}]   ;;  %s3954_s0 = inlined_call_operand.vmem [shape: f32[16,32], index: 0, kind: input, shape index: {}]   ;;  %s3955_s1 = inlined_call_operand.vmem [shape: f32[16,32], index: 1, kind: input, shape index: {}]   ;;  %s3956_s3 = inlined_call_operand.vmem [shape: f32[2,9,64], index: 3, kind: input, shape index: {}]   ;;  %s3957_s4 = inlined_call_operand.vmem [shape: f32[16,32], index: 4, kind: output, shape index: {}]  }
   0x1   :  { %2908 = vmatprep.subr.bf16.mxu1 %v3332_v0  ;;  %v3230_v1 = vld [vmem:[%s3953_s2 + $0x8] sm:$0xff]   ;;  %2912 = vmatprep.mubr.msk.bf16.mxu1 %vm3333_vm0, %v3332_v0  ;;  %v3231_v2 = vld [vmem:[%s3953_s2] sm:$0xff]   ;;  %s3336_s30 = smov 80   ;;  %s3337_s5 = smov 88   ;;  %v3424_v19 = vld [vmem:[%s3953_s2 + $0x18] sm:$0xff]   ;;  %vm243_vm3 = vcmask 1043456  }
   0x2   :  { %2924 = vmatprep.subr.bf16.mxu0 %v3332_v0  ;;  %2926 = vmatprep.mubr.msk.bf16.mxu0 %vm3333_vm0, %v3332_v0  ;;  %v3384_v3 = vld [vmem:[%s3954_s0] sm:$0xff]  ;;  %v3389_v4 = vld [vmem:[%s3954_s0 + $0x8] sm:$0xff]  ;;  %s3338_s6 = smov 72   ;;  %s3339_s7 = smov 112   ;;  %v3430_v20 = vld [vmem:[%s3953_s2 + $0x10] sm:$0xff]   ;;  %vm631_vm4 = vcmask 130048  }
   0x3   :  { %2909 = vmatpush3.bf16.msra.mxu1 %v3230_v1  ;;  %v20_v5 = vld [vmem:[%s3955_s1] sm:$0xff]  ;;  %v21_v6 = vld [vmem:[%s3955_s1 + $0x8] sm:$0xff]  ;;  %s3340_s8 = smov 104   ;;  %v54_v21 = vpack.c.bf16 %v3389_v4, %v3384_v3  ;;  %s3341_s15 = smov 8   ;;  %vm633_vm5 = vcmask 195584   ;;  %vm1276_vm6 = vcmask 523264  }
   0x4   :  { %2910 = vmatprep.subr.bf16.mxu1 %v3332_v0  ;;  %v51_v7 = vadd.f32 %v20_v5, %v3384_v3  ;;  %v52_v8 = vadd.f32 %v21_v6, %v3389_v4  ;;  %v2701_v11 = vld [vmem:[%s3956_s3] ss:$0 sm:$0xff]  ;;  %s3342_s16 = smov 16   ;;  %s3343_s17 = smov 24  }
   0x6   :  { %v53_v9 = vpack.c.bf16 %v52_v8, %v51_v7 }
   0x7   :  { %2911 = vmatpush3.bf16.msra.mxu1 %v3231_v2 }
   0x8   :  { %2916 = vmatprep.subr.bf16.mxu1 %v3332_v0 }
   0xa   :  { %2913 = vmatmul.mubr.msk.bf16.vlgmr.msra.gmra.mxu1 %vm71_vm1, %v53_v9 }
   0xb   :  { %2920 = vmatprep.mubr.msk.bf16.mxu1 %vm3333_vm0, %v3332_v0  ;;  %2917 = vmatpush3.bf16.msra.mxu1 %v3424_v19 }
   0xc   :  { %2918 = vmatprep.subr.bf16.mxu1 %v3332_v0 }
   0xf   :  { %2919 = vmatpush3.bf16.msra.mxu1 %v3430_v20 }
  0x10   :  { %2930 = vmatprep.subr.bf16.mxu1 %v3332_v0 }
  0x12   :  { %2921 = vmatmul.mubr.msk.bf16.vlgmr.msra.gmra.mxu1 %vm71_vm1, %v54_v21 }
  0x13   :  { %2932 = vmatprep.mubr.msk.bf16.mxu1 %vm3333_vm0, %v3332_v0 }
  0xca   :  { %v109_v10 = vpop.f32.mrf.mxu1 }
  0xcb   :  { %v110_v14 = vadd.f32 %v2701_v11, %v109_v10 }
  0xcc   :  { %v2914_v12 = vpop.f32.mrf.mxu1 }
  0xce   :  { %v112_v13 = vpop.f32.mrf.mxu1 }
  0xcf   :  { %v113_v15 = vadd.f32 %v2701_v11, %v112_v13 }
  0xd0   :  { %v2915_v16 = vpop.f32.mrf.mxu1 }
  0xd1   :  { %v176_v17 = vpack.c.bf16 %v113_v15, %v110_v14 }
  0xd2   :  { %v169_v14 = vpop.f32.mrf.mxu1 }
  0xd3   :  { %287 = vrot.lane.b32.xlu1 %v176_v17, %s3334_s28  ;;  %179 = vrot.lane.b32.xlu0 %v176_v17, %s3335_s29  ;;  %v635_v18 = vrot.slane %v176_v17, 4 }
  0xd7   :  { %400 = vrot.lane.b32.xlu1 %v176_v17, %s3336_s30  ;;  %289 = vrot.lane.b32.xlu0 %v176_v17, %s3337_s5 }
  0xdb   :  { %510 = vrot.lane.b32.xlu1 %v176_v17, %s3338_s6  ;;  %398 = vrot.lane.b32.xlu0 %v176_v17, %s3339_s7 }
  0xdf   :  { %508 = vrot.lane.b32.xlu0 %v176_v17, %s3340_s8  ;;  %636 = vrot.lane.b32.xlu1 %v635_v18, %s3335_s29 }
  0xe3   :  { %745 = vrot.lane.b32.xlu0 %v635_v18, %s3337_s5  ;;  %743 = vrot.lane.b32.xlu1 %v635_v18, %s3334_s28 }
  0xe7   :  { %855 = vrot.lane.b32.xlu0 %v635_v18, %s3336_s30  ;;  %853 = vrot.lane.b32.xlu1 %v635_v18, %s3339_s7 }
  0xeb   :  { %965 = vrot.lane.b32.xlu0 %v635_v18, %s3338_s6  ;;  %963 = vrot.lane.b32.xlu1 %v635_v18, %s3340_s8 }
 0x145   :  { %v180_v22 = vpop.permute.xlu0 %179  ;;  %v288_v25 = vpop.permute.xlu1 %287 }
 0x146   :  { %v186_v23 = vsel %vm181_vm2, %v180_v22, 0 }
 0x147   :  { %2925 = vmatpush3.bf16.xpose.msra.mxu0 %v186_v23 }
 0x148   :  { %2936 = vmatprep.subr.bf16.mxu0 %v3332_v0 }
 0x149   :  { %v290_v24 = vpop.permute.xlu0 %289  ;;  %v401_v27 = vpop.permute.xlu1 %400 }
 0x14a   :  { %v295_v26 = vsel %vm181_vm2, %v290_v24, 0  ;;  %v406_v28 = vsel %vm181_vm2, %v401_v27, 0 }
 0x14d   :  { %v511_v29 = vpop.permute.xlu1 %510  ;;  %v399_v30 = vpop.permute.xlu0 %398 }
 0x14e   :  { %2927 = vmatmul.mubr.msk.bf16.vlgmr.msra.gmra.mxu0 %vm181_vm2, %v176_v17  ;;  %v516_v31 = vsel %vm181_vm2, %v511_v29, 0  ;;  %v2922_v17 = vpop.f32.mrf.mxu1 }
 0x14f   :  { %2937 = vmatpush3.bf16.xpose.msra.mxu0 %v295_v26  ;;  %2938 = vmatprep.mubr.msk.bf16.mxu0 %vm3333_vm0, %v3332_v0 }
 0x150   :  { %2948 = vmatprep.subr.bf16.mxu0 %v3332_v0  ;;  %v172_v22 = vpop.f32.mrf.mxu1 }
 0x151   :  { %v637_v32 = vpop.permute.xlu1 %636  ;;  %v509_v33 = vpop.permute.xlu0 %508 }
 0x152   :  { %v642_v34 = vsel %vm181_vm2, %v637_v32, 0 }
 0x155   :  { %v746_v35 = vpop.permute.xlu0 %745  ;;  %v744_v38 = vpop.permute.xlu1 %743 }
 0x156   :  { %2939 = vmatmul.mubr.msk.bf16.vlgmr.msra.gmra.mxu0 %vm181_vm2, %v288_v25  ;;  %v751_v36 = vsel %vm181_vm2, %v746_v35, 0  ;;  %v2923_v25 = vpop.f32.mrf.mxu1 }
 0x157   :  { %2949 = vmatpush3.bf16.xpose.msra.mxu0 %v406_v28  ;;  %2950 = vmatprep.mubr.msk.bf16.mxu0 %vm3333_vm0, %v3332_v0 }
 0x158   :  { %2960 = vmatprep.subr.bf16.mxu0 %v3332_v0 }
 0x159   :  { %v856_v37 = vpop.permute.xlu0 %855  ;;  %v854_v41 = vpop.permute.xlu1 %853 }
 0x15a   :  { %v861_v39 = vsel %vm181_vm2, %v856_v37, 0 }
 0x15d   :  { %v966_v40 = vpop.permute.xlu0 %965  ;;  %v964_v43 = vpop.permute.xlu1 %963 }
 0x15e   :  { %2951 = vmatmul.mubr.msk.bf16.vlgmr.msra.gmra.mxu0 %vm181_vm2, %v399_v30  ;;  %v971_v42 = vsel %vm181_vm2, %v966_v40, 0 }
 0x15f   :  { %2961 = vmatpush3.bf16.xpose.msra.mxu0 %v516_v31  ;;  %2962 = vmatprep.mubr.msk.bf16.mxu0 %vm3333_vm0, %v3332_v0 }
 0x160   :  { %2972 = vmatprep.subr.bf16.mxu0 %v3332_v0 }
 0x166   :  { %2963 = vmatmul.mubr.msk.bf16.vlgmr.msra.gmra.mxu0 %vm181_vm2, %v509_v33 }
 0x167   :  { %2973 = vmatpush3.bf16.xpose.msra.mxu0 %v642_v34  ;;  %2974 = vmatprep.mubr.msk.bf16.mxu0 %vm3333_vm0, %v3332_v0 }
 0x168   :  { %2984 = vmatprep.subr.bf16.mxu0 %v3332_v0 }
 0x16e   :  { %2975 = vmatmul.mubr.msk.bf16.vlgmr.msra.gmra.mxu0 %vm181_vm2, %v635_v18  ;;  %v2705_v18 = vld [vmem:[%s3956_s3 + $0x1] ss:$0 sm:$0xff] }
 0x16f   :  { %2985 = vmatpush3.bf16.xpose.msra.mxu0 %v751_v36  ;;  %2986 = vmatprep.mubr.msk.bf16.mxu0 %vm3333_vm0, %v3332_v0  ;;  %v170_v24 = vadd.f32 %v2705_v18, %v169_v14  ;;  %v173_v27 = vadd.f32 %v2705_v18, %v172_v22 }
 0x170   :  { %2996 = vmatprep.subr.bf16.mxu0 %v3332_v0 }
 0x171   :  { %v3500_v30 = vpack.c.bf16 %v173_v27, %v170_v24 }
 0x173   :  { %v245_v32 = vsel %vm243_vm3, %v3500_v30, 0 }
 0x174   :  { %2931 = vmatpush3.bf16.msra.mxu1 %v245_v32 }
 0x175   :  { %2942 = vmatprep.subr.bf16.mxu1 %v3332_v0 }
 0x176   :  { %2987 = vmatmul.mubr.msk.bf16.vlgmr.msra.gmra.mxu0 %vm181_vm2, %v744_v38 }
 0x177   :  { %2997 = vmatpush3.bf16.xpose.msra.mxu0 %v861_v39  ;;  %2998 = vmatprep.mubr.msk.bf16.mxu0 %vm3333_vm0, %v3332_v0 }
 0x178   :  { %3008 = vmatprep.subr.bf16.mxu0 %v3332_v0 }
 0x17e   :  { %2999 = vmatmul.mubr.msk.bf16.vlgmr.msra.gmra.mxu0 %vm181_vm2, %v854_v41 }
 0x17f   :  { %3009 = vmatpush3.bf16.xpose.msra.mxu0 %v971_v42  ;;  %3010 = vmatprep.mubr.msk.bf16.mxu0 %vm3333_vm0, %v3332_v0 }
 0x180   :  { %3020 = vmatprep.subr.bf16.mxu0 %v3332_v0 }
 0x186   :  { %3011 = vmatmul.mubr.msk.bf16.vlgmr.msra.gmra.mxu0 %vm181_vm2, %v964_v43 }
 0x187   :  { %3024 = vmatprep.mubr.msk.bf16.mxu0 %vm3333_vm0, %v3332_v0 }
 0x20e   :  { %v222_v44 = vpop.f32.mrf.mxu0 }
 0x20f   :  { %v228_v45 = vsel %vm181_vm2, %v222_v44, -inf }
 0x210   :  { %v2928_v46 = vpop.f32.mrf.mxu0  ;;  %229 = vmax.xlane.f32.xlu0 %v228_v45 }
 0x212   :  { %v225_v47 = vpop.f32.mrf.mxu0 }
 0x214   :  { %v2929_v48 = vpop.f32.mrf.mxu0 }
 0x216   :  { %v331_v49 = vpop.f32.mrf.mxu0 }
 0x217   :  { %v337_v50 = vsel %vm181_vm2, %v331_v49, -inf }
 0x218   :  { %v2940_v51 = vpop.f32.mrf.mxu0  ;;  %338 = vmax.xlane.f32.xlu1 %v337_v50 }
 0x21a   :  { %v334_v52 = vpop.f32.mrf.mxu0 }
 0x21c   :  { %v2941_v53 = vpop.f32.mrf.mxu0 }
 0x21e   :  { %v442_v54 = vpop.f32.mrf.mxu0 }
 0x21f   :  { %v448_v55 = vsel %vm181_vm2, %v442_v54, -inf }
 0x220   :  { %v2952_v56 = vpop.f32.mrf.mxu0  ;;  %449 = vmax.xlane.f32.xlu0 %v448_v55 }
 0x222   :  { %v445_v57 = vpop.f32.mrf.mxu0 }
 0x224   :  { %v2953_v58 = vpop.f32.mrf.mxu0 }
 0x226   :  { %v552_v59 = vpop.f32.mrf.mxu0 }
 0x227   :  { %v558_v60 = vsel %vm181_vm2, %v552_v59, -inf }
 0x228   :  { %v2964_v61 = vpop.f32.mrf.mxu0  ;;  %559 = vmax.xlane.f32.xlu0 %v558_v60 }
 0x22a   :  { %v555_v62 = vpop.f32.mrf.mxu0 }
 0x22c   :  { %v2965_v63 = vpop.f32.mrf.mxu0 }
 0x22e   :  { %v3484_v1 = vpop.f32.mrf.mxu0 }
 0x22f   :  { %v684_v2 = vsel %vm181_vm2, %v3484_v1, -inf }
 0x230   :  { %685 = vmax.xlane.f32.xlu1 %v684_v2  ;;  %v2976_v5 = vpop.f32.mrf.mxu0 }
 0x232   :  { %v681_v6 = vpop.f32.mrf.mxu0 }
 0x234   :  { %v2977_v7 = vpop.f32.mrf.mxu0 }
 0x236   :  { %v3488_v8 = vpop.f32.mrf.mxu0 }
 0x237   :  { %v793_v9 = vsel %vm181_vm2, %v3488_v8, -inf }
 0x238   :  { %794 = vmax.xlane.f32.xlu0 %v793_v9  ;;  %v2988_v10 = vpop.f32.mrf.mxu0 }
 0x23a   :  { %v790_v11 = vpop.f32.mrf.mxu0 }
 0x23c   :  { %v2989_v12 = vpop.f32.mrf.mxu0 }
 0x23e   :  { %v3492_v13 = vpop.f32.mrf.mxu0 }
 0x23f   :  { %v903_v15 = vsel %vm181_vm2, %v3492_v13, -inf }
 0x240   :  { %904 = vmax.xlane.f32.xlu1 %v903_v15  ;;  %v3000_v16 = vpop.f32.mrf.mxu0 }
 0x242   :  { %v900_v21 = vpop.f32.mrf.mxu0 }
 0x244   :  { %v3001_v23 = vpop.f32.mrf.mxu0 }
 0x246   :  { %v1007_v26 = vpop.f32.mrf.mxu0 }
 0x247   :  { %v1013_v28 = vsel %vm181_vm2, %v1007_v26, -inf }
 0x248   :  { %1014 = vmax.xlane.f32.xlu0 %v1013_v28  ;;  %v3012_v29 = vpop.f32.mrf.mxu0 }
 0x24a   :  { %v1010_v31 = vpop.f32.mrf.mxu0 }
 0x24c   :  { %v3013_v33 = vpop.f32.mrf.mxu0 }
 0x299   :  { %v230_v34 = vpop.xlane.xlu0 %229 }
 0x29a   :  { %v231_v35 = vsub.f32 %v222_v44, %v230_v34 }
 0x29c   :  { %v232_v36 = vmul.f32 1.442695, %v231_v35 }
 0x29e   :  { %3250 = vpow2.f32 %v232_v36 }
 0x2a1   :  { %v339_v37 = vpop.xlane.xlu1 %338 }
 0x2a2   :  { %v340_v38 = vsub.f32 %v331_v49, %v339_v37 }
 0x2a4   :  { %v341_v39 = vmul.f32 1.442695, %v340_v38 }
 0x2a6   :  { %3252 = vpow2.f32 %v341_v39 }
 0x2a9   :  { %v450_v40 = vpop.xlane.xlu0 %449 }
 0x2aa   :  { %v451_v41 = vsub.f32 %v442_v54, %v450_v40 }
 0x2ab   :  { %v3251_v42 = vpop.eup %3250 }
 0x2ac   :  { %v452_v43 = vmul.f32 1.442695, %v451_v41  ;;  %v234_v45 = vsel %vm181_vm2, %v3251_v42, 0.0 }
 0x2ad   :  { %235 = vadd.xlane.f32.xlu1 %v234_v45 }
 0x2ae   :  { %3254 = vpow2.f32 %v452_v43 }
 0x2b1   :  { %v560_v46 = vpop.xlane.xlu0 %559 }
 0x2b2   :  { %v561_v47 = vsub.f32 %v552_v59, %v560_v46 }
 0x2b3   :  { %v3253_v48 = vpop.eup %3252 }
 0x2b4   :  { %v562_v50 = vmul.f32 1.442695, %v561_v47  ;;  %v343_v44 = vsel %vm181_vm2, %v3253_v48, 0.0 }
 0x2b5   :  { %344 = vadd.xlane.f32.xlu0 %v343_v44 }
 0x2b6   :  { %3256 = vpow2.f32 %v562_v50 }
 0x2b9   :  { %v686_v54 = vpop.xlane.xlu1 %685 }
 0x2ba   :  { %v687_v55 = vsub.f32 %v3484_v1, %v686_v54 }
 0x2bb   :  { %v3507_v51 = vpop.eup %3254 }
 0x2bc   :  { %v454_v49 = vsel %vm181_vm2, %v3507_v51, 0.0  ;;  %v688_v59 = vmul.f32 1.442695, %v687_v55 }
 0x2bd   :  { %455 = vadd.xlane.f32.xlu1 %v454_v49 }
 0x2be   :  { %3258 = vpow2.f32 %v688_v59 }
 0x2c1   :  { %v795_v56 = vpop.xlane.xlu0 %794 }
 0x2c2   :  { %v796_v58 = vsub.f32 %v3488_v8, %v795_v56 }
 0x2c3   :  { %v3511_v52 = vpop.eup %3256 }
 0x2c4   :  { %v564_v53 = vsel %vm181_vm2, %v3511_v52, 0.0  ;;  %v797_v62 = vmul.f32 1.442695, %v796_v58 }
 0x2c5   :  { %565 = vadd.xlane.f32.xlu0 %v564_v53 }
 0x2c6   :  { %3260 = vpow2.f32 %v797_v62 }
 0x2c9   :  { %v905_v57 = vpop.xlane.xlu1 %904 }
 0x2ca   :  { %v906_v60 = vsub.f32 %v3492_v13, %v905_v57  ;;  %v696_v13 = vrot.slane %v3500_v30, 4 }
 0x2cb   :  { %v3524_v6 = vpop.eup %3258 }
 0x2cc   :  { %v907_v63 = vmul.f32 1.442695, %v906_v60  ;;  %v690_v1 = vsel %vm181_vm2, %v3524_v6, 0.0  ;;  %v701_v37 = vsel %vm243_vm3, %v696_v13, 0 }
 0x2ce   :  { %460 = vrot.lane.b32.xlu1 %v3500_v30, %s3339_s7  ;;  %3262 = vpow2.f32 %v907_v63 }
 0x2d1   :  { %v1015_v61 = vpop.xlane.xlu0 %1014 }
 0x2d2   :  { %570 = vrot.lane.b32.xlu1 %v3500_v30, %s3340_s8  ;;  %v1016_v2 = vsub.f32 %v1007_v26, %v1015_v61 }
 0x2d3   :  { %v3526_v7 = vpop.eup %3260 }
 0x2d4   :  { %v1017_v5 = vmul.f32 1.442695, %v1016_v2  ;;  %v799_v9 = vsel %vm181_vm2, %v3526_v7, 0.0 }
 0x2d6   :  { %3264 = vpow2.f32 %v1017_v5 }
 0x2db   :  { %350 = vrot.lane.b32.xlu0 %v3500_v30, %s3334_s28  ;;  %v3530_v8 = vpop.eup %3262 }
 0x2dc   :  { %v909_v10 = vsel %vm181_vm2, %v3530_v8, 0.0 }
 0x2e3   :  { %v3536_v11 = vpop.eup %3264 }
 0x2e4   :  { %v1019_v12 = vsel %vm181_vm2, %v3536_v11, 0.0 }
 0x2f6   :  { %691 = vadd.xlane.f32.xlu1 %v690_v1 }
 0x2fa   :  { %800 = vadd.xlane.f32.xlu1 %v799_v9  ;;  %910 = vadd.xlane.f32.xlu0 %v909_v10 }
 0x2fe   :  { %1020 = vadd.xlane.f32.xlu1 %v1019_v12 }
 0x30f   :  { %915 = vrot.lane.b32.xlu1 %v696_v13, %s3339_s7 }
 0x310   :  { %805 = vrot.lane.b32.xlu0 %v696_v13, %s3334_s28 }
 0x314   :  { %1025 = vrot.lane.b32.xlu0 %v696_v13, %s3340_s8 }
 0x318   :  { %1095 = vrot.lane.b32.xlu0 %v3424_v19, %s3335_s29 }
 0x336   :  { %v236_v14 = vpop.xlane.xlu1 %235 }
 0x337   :  { %3266 = vrcp.f32 %v236_v14 }
 0x33e   :  { %v345_v15 = vpop.xlane.xlu0 %344 }
 0x33f   :  { %3268 = vrcp.f32 %v345_v15 }
 0x344   :  { %v3267_v16 = vpop.eup %3266 }
 0x345   :  { %v238_v17 = vmul.f32 %v3267_v16, %v3251_v42 }
 0x346   :  { %v456_v18 = vpop.xlane.xlu1 %455 }
 0x347   :  { %v239_v21 = vpack.c.bf16 %v238_v17, %v238_v17  ;;  %3270 = vrcp.f32 %v456_v18 }
 0x349   :  { %2933 = vmatmul.mubr.msk.bf16.vlgmr.msra.gmra.mxu1 %vm181_vm2, %v239_v21 }
 0x34a   :  { %2944 = vmatprep.mubr.msk.bf16.mxu1 %vm3333_vm0, %v3332_v0  ;;  %v461_v26 = vpop.permute.xlu1 %460 }
 0x34b   :  { %v466_v29 = vsel %vm243_vm3, %v461_v26, 0 }
 0x34c   :  { %v3269_v22 = vpop.eup %3268 }
 0x34d   :  { %v347_v24 = vmul.f32 %v3269_v22, %v3253_v48 }
 0x34e   :  { %v566_v23 = vpop.xlane.xlu0 %565  ;;  %v571_v31 = vpop.permute.xlu1 %570 }
 0x34f   :  { %3272 = vrcp.f32 %v566_v23  ;;  %v348_v27 = vpack.c.bf16 %v347_v24, %v347_v24  ;;  %v576_v34 = vsel %vm243_vm3, %v571_v31, 0 }
 0x352   :  { %v351_v25 = vpop.permute.xlu0 %350 }
 0x353   :  { %v356_v19 = vsel %vm243_vm3, %v351_v25, 0 }
 0x354   :  { %2943 = vmatpush3.bf16.msra.mxu1 %v356_v19  ;;  %v3271_v28 = vpop.eup %3270 }
 0x355   :  { %2954 = vmatprep.subr.bf16.mxu1 %v3332_v0  ;;  %v458_v30 = vmul.f32 %v3271_v28, %v3507_v51 }
 0x357   :  { %2945 = vmatmul.mubr.msk.bf16.vlgmr.msra.gmra.mxu1 %vm181_vm2, %v348_v27  ;;  %v459_v32 = vpack.c.bf16 %v458_v30, %v458_v30 }
 0x358   :  { %2955 = vmatpush3.bf16.msra.mxu1 %v466_v29  ;;  %2956 = vmatprep.mubr.msk.bf16.mxu1 %vm3333_vm0, %v3332_v0 }
 0x359   :  { %2966 = vmatprep.subr.bf16.mxu1 %v3332_v0 }
 0x35c   :  { %v3273_v33 = vpop.eup %3272 }
 0x35d   :  { %v568_v35 = vmul.f32 %v3273_v33, %v3511_v52 }
 0x35f   :  { %2957 = vmatmul.mubr.msk.bf16.vlgmr.msra.gmra.mxu1 %vm181_vm2, %v459_v32  ;;  %v569_v36 = vpack.c.bf16 %v568_v35, %v568_v35 }
 0x360   :  { %2967 = vmatpush3.bf16.msra.mxu1 %v576_v34  ;;  %2968 = vmatprep.mubr.msk.bf16.mxu1 %vm3333_vm0, %v3332_v0 }
 0x361   :  { %2978 = vmatprep.subr.bf16.mxu1 %v3332_v0 }
 0x367   :  { %2969 = vmatmul.mubr.msk.bf16.vlgmr.msra.gmra.mxu1 %vm181_vm2, %v569_v36 }
 0x368   :  { %2979 = vmatpush3.bf16.msra.mxu1 %v701_v37  ;;  %2980 = vmatprep.mubr.msk.bf16.mxu1 %vm3333_vm0, %v3332_v0 }
 0x369   :  { %2990 = vmatprep.subr.bf16.mxu1 %v3332_v0 }
 0x37f   :  { %v692_v38 = vpop.xlane.xlu1 %691 }
 0x380   :  { %3274 = vrcp.f32 %v692_v38 }
 0x383   :  { %v801_v39 = vpop.xlane.xlu1 %800  ;;  %v911_v40 = vpop.xlane.xlu0 %910 }
 0x384   :  { %3276 = vrcp.f32 %v801_v39 }
 0x385   :  { %3278 = vrcp.f32 %v911_v40 }
 0x387   :  { %v806_v43 = vpop.permute.xlu0 %805  ;;  %v1021_v47 = vpop.xlane.xlu1 %1020 }
 0x388   :  { %v811_v48 = vsel %vm243_vm3, %v806_v43, 0  ;;  %3280 = vrcp.f32 %v1021_v47 }
 0x38b   :  { %v916_v44 = vpop.permute.xlu1 %915  ;;  %v1026_v54 = vpop.permute.xlu0 %1025 }
 0x38c   :  { %v921_v52 = vsel %vm243_vm3, %v916_v44, 0  ;;  %v1031_v57 = vsel %vm243_vm3, %v1026_v54, 0 }
 0x38d   :  { %v3275_v41 = vpop.eup %3274 }
 0x38e   :  { %v694_v42 = vmul.f32 %v3275_v41, %v3524_v6 }
 0x38f   :  { %v1096_v16 = vpop.permute.xlu0 %1095 }
 0x390   :  { %v695_v45 = vpack.c.bf16 %v694_v42, %v694_v42  ;;  %3021 = vmatpush3.bf16.msra.mxu0 %v1096_v16 }
 0x391   :  { %v3277_v46 = vpop.eup %3276  ;;  %3022 = vmatprep.subr.bf16.mxu0 %v3332_v0 }
 0x392   :  { %2981 = vmatmul.mubr.msk.bf16.vlgmr.msra.gmra.mxu1 %vm181_vm2, %v695_v45  ;;  %v803_v50 = vmul.f32 %v3277_v46, %v3526_v7  ;;  %v3279_v49 = vpop.eup %3278 }
 0x393   :  { %2991 = vmatpush3.bf16.msra.mxu1 %v811_v48  ;;  %2992 = vmatprep.mubr.msk.bf16.mxu1 %vm3333_vm0, %v3332_v0  ;;  %v913_v53 = vmul.f32 %v3279_v49, %v3530_v8 }
 0x394   :  { %3002 = vmatprep.subr.bf16.mxu1 %v3332_v0  ;;  %v804_v51 = vpack.c.bf16 %v803_v50, %v803_v50 }
 0x395   :  { %v914_v55 = vpack.c.bf16 %v913_v53, %v913_v53  ;;  %v3281_v56 = vpop.eup %3280 }
 0x396   :  { %v1023_v58 = vmul.f32 %v3281_v56, %v3536_v11 }
 0x398   :  { %v1024_v59 = vpack.c.bf16 %v1023_v58, %v1023_v58 }
 0x39a   :  { %2993 = vmatmul.mubr.msk.bf16.vlgmr.msra.gmra.mxu1 %vm181_vm2, %v804_v51 }
 0x39b   :  { %3003 = vmatpush3.bf16.msra.mxu1 %v921_v52  ;;  %3004 = vmatprep.mubr.msk.bf16.mxu1 %vm3333_vm0, %v3332_v0  ;;  %v2725_v52 = vld [vmem:[%s3956_s3 + $0x2] ss:$0 sm:$0xff] }
 0x39c   :  { %3014 = vmatprep.subr.bf16.mxu1 %v3332_v0 }
 0x3a2   :  { %3005 = vmatmul.mubr.msk.bf16.vlgmr.msra.gmra.mxu1 %vm181_vm2, %v914_v55 }
 0x3a3   :  { %3015 = vmatpush3.bf16.msra.mxu1 %v1031_v57  ;;  %3016 = vmatprep.mubr.msk.bf16.mxu1 %vm3333_vm0, %v3332_v0 }
 0x3a4   :  { %3028 = vmatprep.subr.bf16.mxu1 %v3332_v0 }
 0x3aa   :  { %3017 = vmatmul.mubr.msk.bf16.vlgmr.msra.gmra.mxu1 %vm181_vm2, %v1024_v59 }
 0x3ab   :  { %3032 = vmatprep.mubr.msk.bf16.mxu1 %vm3333_vm0, %v3332_v0 }
 0x409   :  { %v281_v60 = vpop.f32.mrf.mxu1 }
 0x40b   :  { %v2934_v61 = vpop.f32.mrf.mxu1 }
 0x40d   :  { %v284_v62 = vpop.f32.mrf.mxu1 }
 0x40f   :  { %v2935_v63 = vpop.f32.mrf.mxu1 }
 0x417   :  { %v392_v2 = vpop.f32.mrf.mxu1 }
 0x419   :  { %v2946_v5 = vpop.f32.mrf.mxu1 }
 0x41b   :  { %v395_v6 = vpop.f32.mrf.mxu1 }
 0x41d   :  { %v2947_v7 = vpop.f32.mrf.mxu1 }
 0x41f   :  { %v502_v1 = vpop.f32.mrf.mxu1 }
 0x421   :  { %v2958_v8 = vpop.f32.mrf.mxu1 }
 0x423   :  { %v505_v9 = vpop.f32.mrf.mxu1 }
 0x425   :  { %v2959_v10 = vpop.f32.mrf.mxu1 }
 0x427   :  { %v612_v11 = vpop.f32.mrf.mxu1 }
 0x429   :  { %v2970_v12 = vpop.f32.mrf.mxu1 }
 0x42a   :  { %v3236_v12 = vld [vmem:[%s3953_s2 + $0x48] sm:$0xff]  }
 0x42b   :  { %v615_v13 = vpop.f32.mrf.mxu1 }
 0x42d   :  { %v2971_v14 = vpop.f32.mrf.mxu1 }
 0x452   :  { %v737_v15 = vpop.f32.mrf.mxu1 }
 0x454   :  { %v2982_v17 = vpop.f32.mrf.mxu1 }
 0x456   :  { %v740_v18 = vpop.f32.mrf.mxu1 }
 0x458   :  { %v2983_v21 = vpop.f32.mrf.mxu1 }
 0x45a   :  { %v847_v22 = vpop.f32.mrf.mxu1 }
 0x45b   :  { %v3200_v23 = vpack.i.bf16 %v847_v22, %v392_v2 }
 0x45c   :  { %v2994_v24 = vpop.f32.mrf.mxu1 }
 0x45d   :  { %3201 = vrot.lane.b32.xlu1 %v3200_v23, %s3341_s15  ;;  %v2727_v23 = vld [vmem:[%s3956_s3 + $0x5] ss:$0 sm:$0xff] }
 0x45e   :  { %v850_v25 = vpop.f32.mrf.mxu1 }
 0x460   :  { %v2995_v19 = vpop.f32.mrf.mxu1 }
 0x462   :  { %v957_v26 = vpop.f32.mrf.mxu1 }
 0x463   :  { %v3205_v27 = vpack.i.bf16 %v957_v26, %v502_v1  ;;  %v2728_v26 = vld [vmem:[%s3956_s3 + $0x6] ss:$0 sm:$0xff] }
 0x464   :  { %v3006_v28 = vpop.f32.mrf.mxu1 }
 0x465   :  { %3206 = vrot.lane.b32.xlu0 %v3205_v27, %s3342_s16 }
 0x466   :  { %v960_v29 = vpop.f32.mrf.mxu1 }
 0x468   :  { %v3007_v30 = vpop.f32.mrf.mxu1 }
 0x469   :  { %1093 = vrot.lane.b32.xlu0 %v3430_v20, %s3335_s29 }
 0x46a   :  { %v1067_v31 = vpop.f32.mrf.mxu1 }
 0x46b   :  { %v3210_v32 = vpack.i.bf16 %v1067_v31, %v612_v11  ;;  %v3235_v11 = vld [vmem:[%s3953_s2 + $0x20] sm:$0xff]  }
 0x46c   :  { %v3018_v33 = vpop.f32.mrf.mxu1  ;;  %v3237_v31 = vld [vmem:[%s3953_s2 + $0x40] sm:$0xff]  }
 0x46d   :  { %3211 = vrot.lane.b32.xlu1 %v3210_v32, %s3343_s17  ;;  %v3238_v32 = vld [vmem:[%s3953_s2 + $0x38] sm:$0xff]   ;;  %v3239_v33 = vld [vmem:[%s3953_s2 + $0x30] sm:$0xff]  }
 0x46e   :  { %v1070_v34 = vpop.f32.mrf.mxu1 }
 0x46f   :  { %v2729_v34 = vld [vmem:[%s3956_s3 + $0x3] ss:$0 sm:$0xff] }
 0x470   :  { %v3019_v35 = vpop.f32.mrf.mxu1 }
 0x4cf   :  { %v3202_v37 = vpop.permute.xlu1 %3201 }
 0x4d0   :  { %v3204_v39 = vunpack.i.h.bf16 %v3202_v37  ;;  %v3203_v40 = vunpack.i.l.bf16 %v3202_v37 }
 0x4d2   :  { %v1085_v43 = vsel %vm181_vm2, %v737_v15, %v3204_v39  ;;  %v630_v45 = vsel %vm181_vm2, %v281_v60, %v3203_v40 }
 0x4d7   :  { %v3207_v36 = vpop.permute.xlu0 %3206 }
 0x4d8   :  { %v3209_v41 = vunpack.i.h.bf16 %v3207_v36  ;;  %v3208_v42 = vunpack.i.l.bf16 %v3207_v36 }
 0x4da   :  { %v1086_v48 = vsel %vm631_vm4, %v1085_v43, %v3209_v41  ;;  %v632_v50 = vsel %vm631_vm4, %v630_v45, %v3208_v42  ;;  %v2733_v43 = vld [vmem:[%s3956_s3 + $0x4] ss:$0 sm:$0xff] }
 0x4db   :  { %v1094_v38 = vpop.permute.xlu0 %1093 }
 0x4dc   :  { %3023 = vmatpush3.bf16.msra.mxu0 %v1094_v38 }
 0x4dd   :  { %3036 = vmatprep.subr.bf16.mxu0 %v3332_v0 }
 0x4df   :  { %v3212_v20 = vpop.permute.xlu1 %3211 }
 0x4e0   :  { %v3214_v46 = vunpack.i.h.bf16 %v3212_v20  ;;  %v3213_v47 = vunpack.i.l.bf16 %v3212_v20 }
 0x4e2   :  { %v1087_v44 = vsel %vm633_vm5, %v1086_v48, %v3214_v46  ;;  %v634_v51 = vsel %vm633_vm5, %v632_v50, %v3213_v47 }
 0x4e3   :  { %v1088_v49 = vpack.c.bf16 %v1087_v44, %v634_v51 }
 0x4e5   :  { %3025 = vmatmul.mubr.msk.bf16.vlgmr.msra.gmra.mxu0 %vm71_vm1, %v1088_v49 }
 0x4e6   :  { %3044 = vmatprep.mubr.msk.bf16.mxu0 %vm3333_vm0, %v3332_v0  ;;  %3037 = vmatpush3.bf16.msra.mxu0 %v3236_v12 }
 0x4e7   :  { %3038 = vmatprep.subr.bf16.mxu0 %v3332_v0 }
 0x4ea   :  { %3039 = vmatpush3.bf16.msra.mxu0 %v3237_v31 }
 0x4eb   :  { %3040 = vmatprep.subr.bf16.mxu0 %v3332_v0 }
 0x4ee   :  { %3041 = vmatpush3.bf16.msra.mxu0 %v3238_v32 }
 0x4ef   :  { %3042 = vmatprep.subr.bf16.mxu0 %v3332_v0 }
 0x4f2   :  { %3043 = vmatpush3.bf16.msra.mxu0 %v3239_v33 }
 0x4f3   :  { %3064 = vmatprep.subr.bf16.mxu0 %v3332_v0 }
 0x5a5   :  { %v1136_v53 = vpop.f32.mrf.mxu0 }
 0x5a6   :  { %v1137_v54 = vadd.f32 %v2725_v52, %v1136_v53 }
 0x5a7   :  { %v3026_v55 = vpop.f32.mrf.mxu0 }
 0x5a8   :  { %v1143_v56 = vadd.f32 %v1137_v54, %v3384_v3 }
 0x5a9   :  { %v1139_v57 = vpop.f32.mrf.mxu0 }
 0x5aa   :  { %v1140_v58 = vadd.f32 %v2725_v52, %v1139_v57  ;;  %v1145_v59 = vsel %vm71_vm1, %v1143_v56, 0.0 }
 0x5ab   :  { %1146 = vadd.xlane.f32.xlu1 %v1145_v59  ;;  %v3027_v60 = vpop.f32.mrf.mxu0 }
 0x5ac   :  { %v1144_v61 = vadd.f32 %v1140_v58, %v3389_v4  ;;  %v3234_v4 = vld [vmem:[%s3953_s2 + $0x28] sm:$0xff]  }
 0x5ad   :  { %3029 = vmatpush3.bf16.msra.mxu1 %v3234_v4  ;;  %v2739_v4 = vld [vmem:[%s3956_s3 + $0x7] ss:$0 sm:$0xff] }
 0x5ae   :  { %v1148_v62 = vsel %vm71_vm1, %v1144_v61, 0.0  ;;  %3030 = vmatprep.subr.bf16.mxu1 %v3332_v0 }
 0x5af   :  { %1149 = vadd.xlane.f32.xlu0 %v1148_v62 }
 0x5b1   :  { %3031 = vmatpush3.bf16.msra.mxu1 %v3235_v11 }
 0x5b2   :  { %3048 = vmatprep.subr.bf16.mxu1 %v3332_v0 }
 0x634   :  { %v1147_v63 = vpop.xlane.xlu1 %1146 }
 0x635   :  { %v1152_v2 = vmul.f32 0.03125, %v1147_v63 }
 0x637   :  { %v1154_v5 = vsub.f32 %v1143_v56, %v1152_v2  ;;  %v3240_v2 = vld [vmem:[%s3953_s2 + $0x58] sm:$0xff]  }
 0x638   :  { %v1150_v6 = vpop.xlane.xlu0 %1149 }
 0x639   :  { %v1153_v7 = vmul.f32 0.03125, %v1150_v6  ;;  %v1156_v1 = vmul.f32 %v1154_v5, %v1154_v5 }
 0x63b   :  { %v1155_v8 = vsub.f32 %v1144_v61, %v1153_v7  ;;  %v1158_v3 = vsel %vm71_vm1, %v1156_v1, 0.0 }
 0x63c   :  { %1159 = vadd.xlane.f32.xlu0 %v1158_v3 }
 0x63d   :  { %v1157_v9 = vmul.f32 %v1155_v8, %v1155_v8 }
 0x63f   :  { %v1161_v10 = vsel %vm71_vm1, %v1157_v9, 0.0 }
 0x640   :  { %1162 = vadd.xlane.f32.xlu1 %v1161_v10 }
 0x6c5   :  { %v1160_v13 = vpop.xlane.xlu0 %1159 }
 0x6c6   :  { %v1164_v14 = vmul.f32 0.03125, %v1160_v13 }
 0x6c8   :  { %v1166_v15 = vadd.f32 1e-05, %v1164_v14  ;;  %v2740_v14 = vld [vmem:[%s3956_s3 + $0x8] ss:$0 sm:$0xff] }
 0x6c9   :  { %v1163_v16 = vpop.xlane.xlu1 %1162 }
 0x6ca   :  { %3282 = vrsqrt.f32 %v1166_v15  ;;  %v1165_v17 = vmul.f32 0.03125, %v1163_v16 }
 0x6cc   :  { %v1167_v18 = vadd.f32 1e-05, %v1165_v17 }
 0x6ce   :  { %3284 = vrsqrt.f32 %v1167_v18 }
 0x6d7   :  { %v3283_v21 = vpop.eup %3282 }
 0x6d8   :  { %v1170_v22 = vmul.f32 %v3283_v21, %v1154_v5  ;;  %v3241_v5 = vld [vmem:[%s3953_s2 + $0x50] sm:$0xff]   ;;  %v3330_v21 = vld [vmem:[%s3955_s1] sm:$0xff] }
 0x6da   :  { %v1176_v19 = vmul.f32 %v2727_v23, %v1170_v22 }
 0x6db   :  { %v3285_v24 = vpop.eup %3284 }
 0x6dc   :  { %v1171_v25 = vmul.f32 %v3285_v24, %v1155_v8  ;;  %v1182_v28 = vadd.f32 %v2728_v26, %v1176_v19 }
 0x6de   :  { %v1177_v27 = vmul.f32 %v2727_v23, %v1171_v25  ;;  %v3331_v23 = vld [vmem:[%s3955_s1 + $0x8] sm:$0xff] }
 0x6df   :  { %v3690_v25 = vld [vmem:[%s3953_s2 + $0x68] sm:$0xff]  }
 0x6e0   :  { %v1183_v29 = vadd.f32 %v2728_v26, %v1177_v27  ;;  %v3697_v26 = vld [vmem:[%s3953_s2 + $0x60] sm:$0xff]  }
 0x6e2   :  { %v1184_v30 = vpack.c.bf16 %v1183_v29, %v1182_v28 }
 0x6e4   :  { %3033 = vmatmul.mubr.msk.bf16.vlgmr.msra.gmra.mxu1 %vm71_vm1, %v1184_v30 }
 0x6e5   :  { %3052 = vmatprep.mubr.msk.bf16.mxu1 %vm3333_vm0, %v3332_v0  ;;  %3049 = vmatpush3.bf16.msra.mxu1 %v3240_v2 }
 0x6e6   :  { %3050 = vmatprep.subr.bf16.mxu1 %v3332_v0 }
 0x6e9   :  { %3051 = vmatpush3.bf16.msra.mxu1 %v3241_v5 }
 0x6ea   :  { %3056 = vmatprep.subr.bf16.mxu1 %v3332_v0 }
 0x7a4   :  { %v1238_v35 = vpop.f32.mrf.mxu1 }
 0x7a5   :  { %v1239_v37 = vadd.f32 %v2729_v34, %v1238_v35 }
 0x7a6   :  { %v3034_v36 = vpop.f32.mrf.mxu1 }
 0x7a7   :  { %v1245_v41 = vmax.f32 %v1239_v37, 0.0  ;;  %v2774_v37 = vld [vmem:[%s3956_s3 + $0x11] ss:$0 sm:$0xff] }
 0x7a8   :  { %v1241_v38 = vpop.f32.mrf.mxu1 }
 0x7a9   :  { %v1242_v39 = vadd.f32 %v2729_v34, %v1241_v38 }
 0x7aa   :  { %v3035_v40 = vpop.f32.mrf.mxu1 }
 0x7ab   :  { %v1246_v42 = vmax.f32 %v1242_v39, 0.0 }
 0x7ad   :  { %v1247_v20 = vpack.c.bf16 %v1246_v42, %v1245_v41 }
 0x7af   :  { %3045 = vmatmul.mubr.msk.bf16.vlgmr.msra.gmra.mxu0 %vm1276_vm6, %v1247_v20 }
 0x7b0   :  { %3066 = vmatprep.mubr.msk.bf16.mxu0 %vm3333_vm0, %v3332_v0 }
 0x86f   :  { %v1314_v45 = vpop.f32.mrf.mxu0 }
 0x870   :  { %v1315_v46 = vadd.f32 %v2733_v43, %v1314_v45 }
 0x871   :  { %v3046_v47 = vpop.f32.mrf.mxu0 }
 0x872   :  { %v1321_v48 = vadd.f32 %v1315_v46, %v1182_v28 }
 0x873   :  { %v1317_v50 = vpop.f32.mrf.mxu0 }
 0x874   :  { %v1318_v44 = vadd.f32 %v2733_v43, %v1317_v50  ;;  %v1323_v51 = vsel %vm71_vm1, %v1321_v48, 0.0 }
 0x875   :  { %1324 = vadd.xlane.f32.xlu0 %v1323_v51  ;;  %v3047_v49 = vpop.f32.mrf.mxu0 }
 0x876   :  { %v1322_v52 = vadd.f32 %v1318_v44, %v1183_v29  ;;  %v2770_v29 = vld [vmem:[%s3956_s3 + $0x10] ss:$0 sm:$0xff] }
 0x878   :  { %v1326_v53 = vsel %vm71_vm1, %v1322_v52, 0.0 }
 0x879   :  { %1327 = vadd.xlane.f32.xlu1 %v1326_v53 }
 0x8fe   :  { %v1325_v54 = vpop.xlane.xlu0 %1324 }
 0x8ff   :  { %v1329_v55 = vmul.f32 0.03125, %v1325_v54 }
 0x901   :  { %v1331_v56 = vsub.f32 %v1321_v48, %v1329_v55 }
 0x902   :  { %v1328_v57 = vpop.xlane.xlu1 %1327 }
 0x903   :  { %v1330_v58 = vmul.f32 0.03125, %v1328_v57  ;;  %v1333_v59 = vmul.f32 %v1331_v56, %v1331_v56 }
 0x905   :  { %v1332_v60 = vsub.f32 %v1322_v52, %v1330_v58  ;;  %v1335_v61 = vsel %vm71_vm1, %v1333_v59, 0.0 }
 0x906   :  { %1336 = vadd.xlane.f32.xlu0 %v1335_v61 }
 0x907   :  { %v1334_v62 = vmul.f32 %v1332_v60, %v1332_v60 }
 0x909   :  { %v1338_v63 = vsel %vm71_vm1, %v1334_v62, 0.0 }
 0x90a   :  { %1339 = vadd.xlane.f32.xlu1 %v1338_v63 }
 0x98f   :  { %v1337_v6 = vpop.xlane.xlu0 %1336 }
 0x990   :  { %v1341_v7 = vmul.f32 0.03125, %v1337_v6 }
 0x992   :  { %v1343_v1 = vadd.f32 1e-05, %v1341_v7 }
 0x993   :  { %v1340_v8 = vpop.xlane.xlu1 %1339 }
 0x994   :  { %3286 = vrsqrt.f32 %v1343_v1  ;;  %v1342_v3 = vmul.f32 0.03125, %v1340_v8 }
 0x996   :  { %v1344_v9 = vadd.f32 1e-05, %v1342_v3 }
 0x998   :  { %3288 = vrsqrt.f32 %v1344_v9 }
 0x9a1   :  { %v3287_v10 = vpop.eup %3286 }
 0x9a2   :  { %v1347_v11 = vmul.f32 %v3287_v10, %v1331_v56 }
 0x9a4   :  { %v1353_v12 = vmul.f32 %v2739_v4, %v1347_v11 }
 0x9a5   :  { %v3289_v13 = vpop.eup %3288 }
 0x9a6   :  { %v1348_v15 = vmul.f32 %v3289_v13, %v1332_v60  ;;  %v3675_v17 = vadd.f32 %v2740_v14, %v1353_v12 }
 0x9a8   :  { %v1354_v16 = vmul.f32 %v2739_v4, %v1348_v15  ;;  %v1392_v22 = vadd.f32 %v3330_v21, %v3675_v17 }
 0x9aa   :  { %v3677_v18 = vadd.f32 %v2740_v14, %v1354_v16 }
 0x9ac   :  { %v1393_v24 = vadd.f32 %v3331_v23, %v3677_v18  ;;  %v1395_v27 = vpack.c.bf16 %v3677_v18, %v3675_v17 }
 0x9ae   :  { %v1394_v19 = vpack.c.bf16 %v1393_v24, %v1392_v22 }
 0x9b0   :  { %3053 = vmatmul.mubr.msk.bf16.vlgmr.msra.gmra.mxu1 %vm71_vm1, %v1394_v19 }
 0x9b1   :  { %3057 = vmatpush3.bf16.msra.mxu1 %v3690_v25  ;;  %3060 = vmatprep.mubr.msk.bf16.mxu1 %vm3333_vm0, %v3332_v0 }
 0x9b2   :  { %3058 = vmatprep.subr.bf16.mxu1 %v3332_v0 }
 0x9b5   :  { %3059 = vmatpush3.bf16.msra.mxu1 %v3697_v26 }
 0x9b6   :  { %3070 = vmatprep.subr.bf16.mxu1 %v3332_v0 }
 0x9b8   :  { %3061 = vmatmul.mubr.msk.bf16.vlgmr.msra.gmra.mxu1 %vm71_vm1, %v1395_v27 }
 0x9b9   :  { %3072 = vmatprep.mubr.msk.bf16.mxu1 %vm3333_vm0, %v3332_v0 }
 0xa70   :  { %v1449_v28 = vpop.f32.mrf.mxu1 }
 0xa71   :  { %v1450_v32 = vadd.f32 %v2770_v29, %v1449_v28 }
 0xa72   :  { %v3054_v30 = vpop.f32.mrf.mxu1 }
 0xa74   :  { %v1452_v31 = vpop.f32.mrf.mxu1 }
 0xa75   :  { %v1453_v33 = vadd.f32 %v2770_v29, %v1452_v31 }
 0xa76   :  { %v3055_v34 = vpop.f32.mrf.mxu1 }
 0xa77   :  { %v1516_v35 = vpack.c.bf16 %v1453_v33, %v1450_v32 }
 0xa78   :  { %v1509_v36 = vpop.f32.mrf.mxu1 }
 0xa79   :  { %1627 = vrot.lane.b32.xlu1 %v1516_v35, %s3337_s5  ;;  %1519 = vrot.lane.b32.xlu0 %v1516_v35, %s3335_s29  ;;  %v1510_v40 = vadd.f32 %v2774_v37, %v1509_v36  ;;  %v1971_v45 = vrot.slane %v1516_v35, 4 }
 0xa7a   :  { %v3062_v38 = vpop.f32.mrf.mxu1 }
 0xa7c   :  { %v1512_v39 = vpop.f32.mrf.mxu1 }
 0xa7d   :  { %v1513_v41 = vadd.f32 %v2774_v37, %v1512_v39  ;;  %1625 = vrot.lane.b32.xlu1 %v1516_v35, %s3334_s28  ;;  %1738 = vrot.lane.b32.xlu0 %v1516_v35, %s3336_s30 }
 0xa7e   :  { %v3063_v42 = vpop.f32.mrf.mxu1 }
 0xa7f   :  { %v3719_v20 = vpack.c.bf16 %v1513_v41, %v1510_v40 }
 0xa81   :  { %1736 = vrot.lane.b32.xlu1 %v1516_v35, %s3339_s7  ;;  %1848 = vrot.lane.b32.xlu0 %v1516_v35, %s3338_s6  ;;  %v1583_v43 = vsel %vm243_vm3, %v3719_v20, 0 }
 0xa82   :  { %3071 = vmatpush3.bf16.msra.mxu1 %v1583_v43 }
 0xa83   :  { %3082 = vmatprep.subr.bf16.mxu1 %v3332_v0 }
 0xa85   :  { %1846 = vrot.lane.b32.xlu1 %v1516_v35, %s3340_s8  ;;  %1972 = vrot.lane.b32.xlu0 %v1971_v45, %s3335_s29 }
 0xa89   :  { %2081 = vrot.lane.b32.xlu1 %v1971_v45, %s3337_s5  ;;  %2079 = vrot.lane.b32.xlu0 %v1971_v45, %s3334_s28 }
 0xa8d   :  { %2191 = vrot.lane.b32.xlu1 %v1971_v45, %s3336_s30  ;;  %2189 = vrot.lane.b32.xlu0 %v1971_v45, %s3339_s7 }
 0xa91   :  { %2301 = vrot.lane.b32.xlu1 %v1971_v45, %s3338_s6  ;;  %2299 = vrot.lane.b32.xlu0 %v1971_v45, %s3340_s8 }
 0xaeb   :  { %v1520_v46 = vpop.permute.xlu0 %1519  ;;  %v1628_v48 = vpop.permute.xlu1 %1627 }
 0xaec   :  { %v1525_v47 = vsel %vm181_vm2, %v1520_v46, 0  ;;  %v1633_v50 = vsel %vm181_vm2, %v1628_v48, 0 }
 0xaed   :  { %3065 = vmatpush3.bf16.xpose.msra.mxu0 %v1525_v47 }
 0xaee   :  { %3076 = vmatprep.subr.bf16.mxu0 %v3332_v0 }
 0xaef   :  { %v1739_v44 = vpop.permute.xlu0 %1738  ;;  %v1626_v51 = vpop.permute.xlu1 %1625 }
 0xaf0   :  { %v1744_v49 = vsel %vm181_vm2, %v1739_v44, 0 }
 0xaf3   :  { %v1849_v52 = vpop.permute.xlu0 %1848  ;;  %v1737_v53 = vpop.permute.xlu1 %1736 }
 0xaf4   :  { %3067 = vmatmul.mubr.msk.bf16.vlgmr.msra.gmra.mxu0 %vm181_vm2, %v1516_v35  ;;  %v1854_v54 = vsel %vm181_vm2, %v1849_v52, 0 }
 0xaf5   :  { %3077 = vmatpush3.bf16.xpose.msra.mxu0 %v1633_v50  ;;  %3078 = vmatprep.mubr.msk.bf16.mxu0 %vm3333_vm0, %v3332_v0 }
 0xaf6   :  { %3088 = vmatprep.subr.bf16.mxu0 %v3332_v0 }
 0xaf7   :  { %v1973_v55 = vpop.permute.xlu0 %1972  ;;  %v1847_v56 = vpop.permute.xlu1 %1846 }
 0xaf8   :  { %v1978_v57 = vsel %vm181_vm2, %v1973_v55, 0 }
 0xafb   :  { %v2082_v58 = vpop.permute.xlu1 %2081  ;;  %v2080_v61 = vpop.permute.xlu0 %2079 }
 0xafc   :  { %3079 = vmatmul.mubr.msk.bf16.vlgmr.msra.gmra.mxu0 %vm181_vm2, %v1626_v51  ;;  %v2087_v59 = vsel %vm181_vm2, %v2082_v58, 0 }
 0xafd   :  { %3089 = vmatpush3.bf16.xpose.msra.mxu0 %v1744_v49  ;;  %3090 = vmatprep.mubr.msk.bf16.mxu0 %vm3333_vm0, %v3332_v0 }
 0xafe   :  { %3100 = vmatprep.subr.bf16.mxu0 %v3332_v0 }
 0xaff   :  { %v2192_v60 = vpop.permute.xlu1 %2191  ;;  %v2190_v2 = vpop.permute.xlu0 %2189 }
 0xb00   :  { %v2197_v62 = vsel %vm181_vm2, %v2192_v60, 0 }
 0xb03   :  { %v2302_v63 = vpop.permute.xlu1 %2301  ;;  %v2300_v6 = vpop.permute.xlu0 %2299 }
 0xb04   :  { %3091 = vmatmul.mubr.msk.bf16.vlgmr.msra.gmra.mxu0 %vm181_vm2, %v1737_v53  ;;  %v2307_v5 = vsel %vm181_vm2, %v2302_v63, 0 }
 0xb05   :  { %3101 = vmatpush3.bf16.xpose.msra.mxu0 %v1854_v54  ;;  %3102 = vmatprep.mubr.msk.bf16.mxu0 %vm3333_vm0, %v3332_v0 }
 0xb06   :  { %3112 = vmatprep.subr.bf16.mxu0 %v3332_v0 }
 0xb0c   :  { %3103 = vmatmul.mubr.msk.bf16.vlgmr.msra.gmra.mxu0 %vm181_vm2, %v1847_v56 }
 0xb0d   :  { %3113 = vmatpush3.bf16.xpose.msra.mxu0 %v1978_v57  ;;  %3114 = vmatprep.mubr.msk.bf16.mxu0 %vm3333_vm0, %v3332_v0 }
 0xb0e   :  { %3124 = vmatprep.subr.bf16.mxu0 %v3332_v0 }
 0xb14   :  { %3115 = vmatmul.mubr.msk.bf16.vlgmr.msra.gmra.mxu0 %vm181_vm2, %v1971_v45 }
 0xb15   :  { %3125 = vmatpush3.bf16.xpose.msra.mxu0 %v2087_v59  ;;  %3126 = vmatprep.mubr.msk.bf16.mxu0 %vm3333_vm0, %v3332_v0 }
 0xb16   :  { %3136 = vmatprep.subr.bf16.mxu0 %v3332_v0 }
 0xb1c   :  { %3127 = vmatmul.mubr.msk.bf16.vlgmr.msra.gmra.mxu0 %vm181_vm2, %v2080_v61 }
 0xb1d   :  { %3137 = vmatpush3.bf16.xpose.msra.mxu0 %v2197_v62  ;;  %3138 = vmatprep.mubr.msk.bf16.mxu0 %vm3333_vm0, %v3332_v0 }
 0xb1e   :  { %3148 = vmatprep.subr.bf16.mxu0 %v3332_v0 }
 0xb24   :  { %3139 = vmatmul.mubr.msk.bf16.vlgmr.msra.gmra.mxu0 %vm181_vm2, %v2190_v2 }
 0xb25   :  { %3149 = vmatpush3.bf16.xpose.msra.mxu0 %v2307_v5  ;;  %3150 = vmatprep.mubr.msk.bf16.mxu0 %vm3333_vm0, %v3332_v0 }
 0xb26   :  { %3160 = vmatprep.subr.bf16.mxu0 %v3332_v0 }
 0xb2c   :  { %3151 = vmatmul.mubr.msk.bf16.vlgmr.msra.gmra.mxu0 %vm181_vm2, %v2300_v6 }
 0xb2d   :  { %3164 = vmatprep.mubr.msk.bf16.mxu0 %vm3333_vm0, %v3332_v0 }
 0xbb4   :  { %v1561_v7 = vpop.f32.mrf.mxu0 }
 0xbb5   :  { %v1567_v1 = vsel %vm181_vm2, %v1561_v7, -inf }
 0xbb6   :  { %v3068_v8 = vpop.f32.mrf.mxu0  ;;  %1568 = vmax.xlane.f32.xlu1 %v1567_v1 }
 0xbb8   :  { %v1564_v3 = vpop.f32.mrf.mxu0 }
 0xbba   :  { %v3069_v9 = vpop.f32.mrf.mxu0 }
 0xbbc   :  { %v1669_v10 = vpop.f32.mrf.mxu0 }
 0xbbd   :  { %v1675_v4 = vsel %vm181_vm2, %v1669_v10, -inf }
 0xbbe   :  { %v3080_v11 = vpop.f32.mrf.mxu0  ;;  %1676 = vmax.xlane.f32.xlu0 %v1675_v4 }
 0xbbf   :  { %v3804_v11 = vrot.slane %v3719_v20, 4 }
 0xbc0   :  { %v1672_v12 = vpop.f32.mrf.mxu0 }
 0xbc2   :  { %v3081_v13 = vpop.f32.mrf.mxu0 }
 0xbc4   :  { %v1780_v14 = vpop.f32.mrf.mxu0 }
 0xbc5   :  { %v1786_v15 = vsel %vm181_vm2, %v1780_v14, -inf }
 0xbc6   :  { %v3092_v16 = vpop.f32.mrf.mxu0  ;;  %1787 = vmax.xlane.f32.xlu0 %v1786_v15 }
 0xbc8   :  { %v1783_v21 = vpop.f32.mrf.mxu0 }
 0xbca   :  { %v3093_v22 = vpop.f32.mrf.mxu0 }
 0xbcc   :  { %v1890_v23 = vpop.f32.mrf.mxu0 }
 0xbcd   :  { %v1896_v24 = vsel %vm181_vm2, %v1890_v23, -inf }
 0xbce   :  { %v3104_v19 = vpop.f32.mrf.mxu0  ;;  %1897 = vmax.xlane.f32.xlu1 %v1896_v24 }
 0xbd0   :  { %v1893_v27 = vpop.f32.mrf.mxu0 }
 0xbd2   :  { %v3105_v28 = vpop.f32.mrf.mxu0 }
 0xbd4   :  { %v2014_v29 = vpop.f32.mrf.mxu0 }
 0xbd5   :  { %v2020_v30 = vsel %vm181_vm2, %v2014_v29, -inf }
 0xbd6   :  { %2021 = vmax.xlane.f32.xlu0 %v2020_v30  ;;  %v3116_v31 = vpop.f32.mrf.mxu0 }
 0xbd8   :  { %v2017_v32 = vpop.f32.mrf.mxu0 }
 0xbda   :  { %v3117_v33 = vpop.f32.mrf.mxu0 }
 0xbdc   :  { %v3779_v34 = vpop.f32.mrf.mxu0 }
 0xbdd   :  { %v2129_v35 = vsel %vm181_vm2, %v3779_v34, -inf }
 0xbde   :  { %2130 = vmax.xlane.f32.xlu1 %v2129_v35  ;;  %v3128_v36 = vpop.f32.mrf.mxu0 }
 0xbe0   :  { %v2126_v37 = vpop.f32.mrf.mxu0 }
 0xbe2   :  { %v3129_v38 = vpop.f32.mrf.mxu0 }
 0xbe4   :  { %v2233_v39 = vpop.f32.mrf.mxu0 }
 0xbe5   :  { %v2239_v40 = vsel %vm181_vm2, %v2233_v39, -inf }
 0xbe6   :  { %2240 = vmax.xlane.f32.xlu0 %v2239_v40  ;;  %v3140_v41 = vpop.f32.mrf.mxu0 }
 0xbe8   :  { %v2236_v42 = vpop.f32.mrf.mxu0 }
 0xbea   :  { %v3141_v43 = vpop.f32.mrf.mxu0 }
 0xbec   :  { %v2343_v45 = vpop.f32.mrf.mxu0 }
 0xbed   :  { %v2349_v46 = vsel %vm181_vm2, %v2343_v45, -inf }
 0xbee   :  { %2350 = vmax.xlane.f32.xlu1 %v2349_v46  ;;  %v3152_v47 = vpop.f32.mrf.mxu0 }
 0xbf0   :  { %v2346_v48 = vpop.f32.mrf.mxu0 }
 0xbf2   :  { %v3153_v50 = vpop.f32.mrf.mxu0 }
 0xbfc   :  { %1798 = vrot.lane.b32.xlu0 %v3719_v20, %s3339_s7 }
 0xbff   :  { %1688 = vrot.lane.b32.xlu1 %v3719_v20, %s3334_s28 }
 0xc3f   :  { %v1569_v44 = vpop.xlane.xlu1 %1568 }
 0xc40   :  { %v1570_v51 = vsub.f32 %v1561_v7, %v1569_v44 }
 0xc42   :  { %v1571_v49 = vmul.f32 1.442695, %v1570_v51 }
 0xc44   :  { %3290 = vpow2.f32 %v1571_v49 }
 0xc47   :  { %v1677_v52 = vpop.xlane.xlu0 %1676 }
 0xc48   :  { %v1678_v53 = vsub.f32 %v1669_v10, %v1677_v52 }
 0xc4a   :  { %v1679_v54 = vmul.f32 1.442695, %v1678_v53  ;;  %v2037_v53 = vsel %vm243_vm3, %v3804_v11, 0 }
 0xc4c   :  { %3292 = vpow2.f32 %v1679_v54 }
 0xc4f   :  { %v1788_v55 = vpop.xlane.xlu0 %1787 }
 0xc50   :  { %v1789_v56 = vsub.f32 %v1780_v14, %v1788_v55 }
 0xc51   :  { %v3291_v57 = vpop.eup %3290 }
 0xc52   :  { %v1790_v58 = vmul.f32 1.442695, %v1789_v56  ;;  %v1573_v59 = vsel %vm181_vm2, %v3291_v57, 0.0 }
 0xc53   :  { %1574 = vadd.xlane.f32.xlu0 %v1573_v59 }
 0xc54   :  { %3294 = vpow2.f32 %v1790_v58 }
 0xc57   :  { %v1898_v60 = vpop.xlane.xlu1 %1897 }
 0xc58   :  { %v1899_v61 = vsub.f32 %v1890_v23, %v1898_v60 }
 0xc59   :  { %v3293_v62 = vpop.eup %3292 }
 0xc5a   :  { %v1900_v63 = vmul.f32 1.442695, %v1899_v61  ;;  %v1681_v2 = vsel %vm181_vm2, %v3293_v62, 0.0 }
 0xc5b   :  { %1682 = vadd.xlane.f32.xlu1 %v1681_v2 }
 0xc5c   :  { %3296 = vpow2.f32 %v1900_v63 }
 0xc5f   :  { %v2022_v5 = vpop.xlane.xlu0 %2021 }
 0xc60   :  { %v2023_v6 = vsub.f32 %v2014_v29, %v2022_v5 }
 0xc61   :  { %v3791_v7 = vpop.eup %3294 }
 0xc62   :  { %v2024_v1 = vmul.f32 1.442695, %v2023_v6  ;;  %v1792_v8 = vsel %vm181_vm2, %v3791_v7, 0.0 }
 0xc63   :  { %1793 = vadd.xlane.f32.xlu0 %v1792_v8 }
 0xc64   :  { %3298 = vpow2.f32 %v2024_v1 }
 0xc67   :  { %v2131_v15 = vpop.xlane.xlu1 %2130 }
 0xc68   :  { %v2132_v16 = vsub.f32 %v3779_v34, %v2131_v15 }
 0xc69   :  { %v3795_v3 = vpop.eup %3296 }
 0xc6a   :  { %v1902_v9 = vsel %vm181_vm2, %v3795_v3, 0.0  ;;  %v2133_v22 = vmul.f32 1.442695, %v2132_v16 }
 0xc6b   :  { %1903 = vadd.xlane.f32.xlu1 %v1902_v9 }
 0xc6f   :  { %v2241_v12 = vpop.xlane.xlu0 %2240 }
 0xc70   :  { %v2242_v13 = vsub.f32 %v2233_v39, %v2241_v12 }
 0xc71   :  { %v3799_v10 = vpop.eup %3298 }
 0xc72   :  { %v2026_v4 = vsel %vm181_vm2, %v3799_v10, 0.0  ;;  %v2243_v14 = vmul.f32 1.442695, %v2242_v13 }
 0xc73   :  { %2027 = vadd.xlane.f32.xlu0 %v2026_v4  ;;  %v1799_v31 = vpop.permute.xlu0 %1798 }
 0xc74   :  { %3300 = vpow2.f32 %v2243_v14  ;;  %v1804_v43 = vsel %vm243_vm3, %v1799_v31, 0 }
 0xc75   :  { %3302 = vpow2.f32 %v2133_v22 }
 0xc77   :  { %v2351_v21 = vpop.xlane.xlu1 %2350 }
 0xc78   :  { %v2352_v23 = vsub.f32 %v2343_v45, %v2351_v21 }
 0xc7a   :  { %v2353_v24 = vmul.f32 1.442695, %v2352_v23 }
 0xc7b   :  { %v1689_v33 = vpop.permute.xlu1 %1688 }
 0xc7c   :  { %2141 = vrot.lane.b32.xlu1 %v3804_v11, %s3334_s28  ;;  %3304 = vpow2.f32 %v2353_v24  ;;  %v1694_v39 = vsel %vm243_vm3, %v1689_v33, 0 }
 0xc81   :  { %v3811_v19 = vpop.eup %3300 }
 0xc82   :  { %v2245_v27 = vsel %vm181_vm2, %v3811_v19, 0.0  ;;  %v3815_v28 = vpop.eup %3302 }
 0xc89   :  { %1908 = vrot.lane.b32.xlu0 %v3719_v20, %s3340_s8  ;;  %v2135_v20 = vsel %vm181_vm2, %v3815_v28, 0.0  ;;  %v3819_v29 = vpop.eup %3304 }
 0xc8a   :  { %v2355_v30 = vsel %vm181_vm2, %v3819_v29, 0.0 }
 0xca0   :  { %2246 = vadd.xlane.f32.xlu1 %v2245_v27 }
 0xca8   :  { %2136 = vadd.xlane.f32.xlu0 %v2135_v20 }
 0xcac   :  { %2356 = vadd.xlane.f32.xlu0 %v2355_v30 }
 0xcb1   :  { %2361 = vrot.lane.b32.xlu1 %v3804_v11, %s3340_s8 }
 0xcb5   :  { %2431 = vrot.lane.b32.xlu1 %v3690_v25, %s3335_s29 }
 0xcc2   :  { %2251 = vrot.lane.b32.xlu0 %v3804_v11, %s3339_s7 }
 0xcdc   :  { %v1575_v32 = vpop.xlane.xlu0 %1574 }
 0xcdd   :  { %3306 = vrcp.f32 %v1575_v32 }
 0xce4   :  { %v1683_v34 = vpop.xlane.xlu1 %1682 }
 0xce5   :  { %3308 = vrcp.f32 %v1683_v34 }
 0xcea   :  { %v3307_v35 = vpop.eup %3306 }
 0xceb   :  { %v1577_v36 = vmul.f32 %v3307_v35, %v3291_v57 }
 0xcec   :  { %v1794_v37 = vpop.xlane.xlu0 %1793 }
 0xced   :  { %3310 = vrcp.f32 %v1794_v37  ;;  %v1578_v38 = vpack.c.bf16 %v1577_v36, %v1577_v36 }
 0xcef   :  { %3073 = vmatmul.mubr.msk.bf16.vlgmr.msra.gmra.mxu1 %vm181_vm2, %v1578_v38 }
 0xcf0   :  { %3083 = vmatpush3.bf16.msra.mxu1 %v1694_v39  ;;  %3084 = vmatprep.mubr.msk.bf16.mxu1 %vm3333_vm0, %v3332_v0 }
 0xcf1   :  { %3094 = vmatprep.subr.bf16.mxu1 %v3332_v0 }
 0xcf2   :  { %v3309_v25 = vpop.eup %3308 }
 0xcf3   :  { %v1685_v40 = vmul.f32 %v3309_v25, %v3293_v62 }
 0xcf4   :  { %v1904_v41 = vpop.xlane.xlu1 %1903 }
 0xcf5   :  { %3312 = vrcp.f32 %v1904_v41  ;;  %v1686_v42 = vpack.c.bf16 %v1685_v40, %v1685_v40 }
 0xcf7   :  { %3085 = vmatmul.mubr.msk.bf16.vlgmr.msra.gmra.mxu1 %vm181_vm2, %v1686_v42 }
 0xcf8   :  { %3095 = vmatpush3.bf16.msra.mxu1 %v1804_v43  ;;  %3096 = vmatprep.mubr.msk.bf16.mxu1 %vm3333_vm0, %v3332_v0  ;;  %v2142_v56 = vpop.permute.xlu1 %2141 }
 0xcf9   :  { %3106 = vmatprep.subr.bf16.mxu1 %v3332_v0  ;;  %v2147_v58 = vsel %vm243_vm3, %v2142_v56, 0 }
 0xcfa   :  { %v3311_v45 = vpop.eup %3310 }
 0xcfb   :  { %v1796_v46 = vmul.f32 %v3311_v45, %v3791_v7 }
 0xcfc   :  { %v2028_v47 = vpop.xlane.xlu0 %2027 }
 0xcfd   :  { %3314 = vrcp.f32 %v2028_v47  ;;  %v1797_v48 = vpack.c.bf16 %v1796_v46, %v1796_v46 }
 0xcff   :  { %3097 = vmatmul.mubr.msk.bf16.vlgmr.msra.gmra.mxu1 %vm181_vm2, %v1797_v48 }
 0xd00   :  { %v1909_v50 = vpop.permute.xlu0 %1908  ;;  %3108 = vmatprep.mubr.msk.bf16.mxu1 %vm3333_vm0, %v3332_v0 }
 0xd01   :  { %v1914_v44 = vsel %vm243_vm3, %v1909_v50, 0 }
 0xd02   :  { %v3313_v51 = vpop.eup %3312  ;;  %3107 = vmatpush3.bf16.msra.mxu1 %v1914_v44 }
 0xd03   :  { %3118 = vmatprep.subr.bf16.mxu1 %v3332_v0  ;;  %v1906_v49 = vmul.f32 %v3313_v51, %v3795_v3 }
 0xd05   :  { %v1907_v52 = vpack.c.bf16 %v1906_v49, %v1906_v49 }
 0xd07   :  { %3109 = vmatmul.mubr.msk.bf16.vlgmr.msra.gmra.mxu1 %vm181_vm2, %v1907_v52 }
 0xd08   :  { %3119 = vmatpush3.bf16.msra.mxu1 %v2037_v53  ;;  %3120 = vmatprep.mubr.msk.bf16.mxu1 %vm3333_vm0, %v3332_v0 }
 0xd09   :  { %3130 = vmatprep.subr.bf16.mxu1 %v3332_v0 }
 0xd0a   :  { %v3315_v54 = vpop.eup %3314 }
 0xd0b   :  { %v2030_v55 = vmul.f32 %v3315_v54, %v3799_v10 }
 0xd0d   :  { %v2031_v57 = vpack.c.bf16 %v2030_v55, %v2030_v55 }
 0xd0f   :  { %3121 = vmatmul.mubr.msk.bf16.vlgmr.msra.gmra.mxu1 %vm181_vm2, %v2031_v57 }
 0xd10   :  { %3131 = vmatpush3.bf16.msra.mxu1 %v2147_v58  ;;  %3132 = vmatprep.mubr.msk.bf16.mxu1 %vm3333_vm0, %v3332_v0 }
 0xd11   :  { %3142 = vmatprep.subr.bf16.mxu1 %v3332_v0 }
 0xd29   :  { %v2247_v60 = vpop.xlane.xlu1 %2246 }
 0xd2d   :  { %v2362_v8 = vpop.permute.xlu1 %2361 }
 0xd2e   :  { %v2367_v10 = vsel %vm243_vm3, %v2362_v8, 0 }
 0xd31   :  { %v2137_v59 = vpop.xlane.xlu0 %2136  ;;  %v2432_v12 = vpop.permute.xlu1 %2431 }
 0xd32   :  { %3316 = vrcp.f32 %v2137_v59  ;;  %3161 = vmatpush3.bf16.msra.mxu0 %v2432_v12 }
 0xd33   :  { %3318 = vrcp.f32 %v2247_v60  ;;  %3162 = vmatprep.subr.bf16.mxu0 %v3332_v0 }
 0xd35   :  { %v2357_v61 = vpop.xlane.xlu0 %2356 }
 0xd36   :  { %3320 = vrcp.f32 %v2357_v61 }
 0xd39   :  { %v2252_v2 = vpop.permute.xlu0 %2251 }
 0xd3a   :  { %v2257_v7 = vsel %vm243_vm3, %v2252_v2, 0 }
 0xd3f   :  { %v3317_v62 = vpop.eup %3316 }
 0xd40   :  { %v2139_v63 = vmul.f32 %v3317_v62, %v3815_v28  ;;  %v3319_v6 = vpop.eup %3318 }
 0xd41   :  { %v2249_v1 = vmul.f32 %v3319_v6, %v3811_v19 }
 0xd42   :  { %v2140_v5 = vpack.c.bf16 %v2139_v63, %v2139_v63 }
 0xd43   :  { %v2250_v3 = vpack.c.bf16 %v2249_v1, %v2249_v1  ;;  %v3321_v9 = vpop.eup %3320 }
 0xd44   :  { %3133 = vmatmul.mubr.msk.bf16.vlgmr.msra.gmra.mxu1 %vm181_vm2, %v2140_v5  ;;  %v2359_v4 = vmul.f32 %v3321_v9, %v3819_v29 }
 0xd45   :  { %3143 = vmatpush3.bf16.msra.mxu1 %v2257_v7  ;;  %3144 = vmatprep.mubr.msk.bf16.mxu1 %vm3333_vm0, %v3332_v0  ;;  %v2794_v7 = vld [vmem:[%s3956_s3 + $0x12] ss:$0 sm:$0xff] }
 0xd46   :  { %3154 = vmatprep.subr.bf16.mxu1 %v3332_v0  ;;  %v2360_v11 = vpack.c.bf16 %v2359_v4, %v2359_v4 }
 0xd4c   :  { %3145 = vmatmul.mubr.msk.bf16.vlgmr.msra.gmra.mxu1 %vm181_vm2, %v2250_v3 }
 0xd4d   :  { %3155 = vmatpush3.bf16.msra.mxu1 %v2367_v10  ;;  %3156 = vmatprep.mubr.msk.bf16.mxu1 %vm3333_vm0, %v3332_v0 }
 0xd4e   :  { %3168 = vmatprep.subr.bf16.mxu1 %v3332_v0 }
 0xd54   :  { %3157 = vmatmul.mubr.msk.bf16.vlgmr.msra.gmra.mxu1 %vm181_vm2, %v2360_v11 }
 0xd55   :  { %3172 = vmatprep.mubr.msk.bf16.mxu1 %vm3333_vm0, %v3332_v0 }
 0xdaf   :  { %v1619_v13 = vpop.f32.mrf.mxu1 }
 0xdb1   :  { %v3074_v14 = vpop.f32.mrf.mxu1 }
 0xdb3   :  { %v1622_v15 = vpop.f32.mrf.mxu1 }
 0xdb5   :  { %v3075_v16 = vpop.f32.mrf.mxu1 }
 0xdb7   :  { %v1730_v21 = vpop.f32.mrf.mxu1 }
 0xdb9   :  { %v3086_v22 = vpop.f32.mrf.mxu1 }
 0xdbb   :  { %v1733_v23 = vpop.f32.mrf.mxu1 }
 0xdbd   :  { %v3087_v24 = vpop.f32.mrf.mxu1 }
 0xdbf   :  { %v1840_v19 = vpop.f32.mrf.mxu1 }
 0xdc1   :  { %v3098_v27 = vpop.f32.mrf.mxu1 }
 0xdc3   :  { %v1843_v28 = vpop.f32.mrf.mxu1 }
 0xdc5   :  { %v3099_v20 = vpop.f32.mrf.mxu1 }
 0xdc6   :  { %v3245_v20 = vld [vmem:[%s3953_s2 + $0x70] sm:$0xff]  }
 0xdc7   :  { %v1950_v29 = vpop.f32.mrf.mxu1 }
 0xdc9   :  { %v3110_v30 = vpop.f32.mrf.mxu1 }
 0xdcb   :  { %v1953_v31 = vpop.f32.mrf.mxu1 }
 0xdcd   :  { %v3111_v32 = vpop.f32.mrf.mxu1 }
 0xdcf   :  { %v2073_v33 = vpop.f32.mrf.mxu1 }
 0xdd1   :  { %v3122_v34 = vpop.f32.mrf.mxu1 }
 0xdd3   :  { %v2076_v35 = vpop.f32.mrf.mxu1 }
 0xdd5   :  { %v3123_v36 = vpop.f32.mrf.mxu1 }
 0xe04   :  { %v2183_v37 = vpop.f32.mrf.mxu1 }
 0xe05   :  { %v3215_v38 = vpack.i.bf16 %v2183_v37, %v1730_v21 }
 0xe06   :  { %v3134_v39 = vpop.f32.mrf.mxu1 }
 0xe07   :  { %3216 = vrot.lane.b32.xlu1 %v3215_v38, %s3341_s15  ;;  %v2796_v38 = vld [vmem:[%s3956_s3 + $0x15] ss:$0 sm:$0xff] }
 0xe08   :  { %v2186_v25 = vpop.f32.mrf.mxu1 }
 0xe0a   :  { %v3135_v40 = vpop.f32.mrf.mxu1 }
 0xe0c   :  { %v2293_v41 = vpop.f32.mrf.mxu1 }
 0xe0d   :  { %v3220_v42 = vpack.i.bf16 %v2293_v41, %v1840_v19  ;;  %v2797_v41 = vld [vmem:[%s3956_s3 + $0x16] ss:$0 sm:$0xff] }
 0xe0e   :  { %v3146_v43 = vpop.f32.mrf.mxu1 }
 0xe0f   :  { %3221 = vrot.lane.b32.xlu1 %v3220_v42, %s3342_s16 }
 0xe10   :  { %v2296_v45 = vpop.f32.mrf.mxu1 }
 0xe12   :  { %v3147_v46 = vpop.f32.mrf.mxu1 }
 0xe13   :  { %2429 = vrot.lane.b32.xlu1 %v3697_v26, %s3335_s29 }
 0xe14   :  { %v2403_v47 = vpop.f32.mrf.mxu1 }
 0xe15   :  { %v3225_v48 = vpack.i.bf16 %v2403_v47, %v1950_v29  ;;  %v3246_v29 = vld [vmem:[%s3953_s2 + $0x98] sm:$0xff]   ;;  %v3247_v47 = vld [vmem:[%s3953_s2 + $0x90] sm:$0xff]  }
 0xe16   :  { %v3158_v50 = vpop.f32.mrf.mxu1 }
 0xe17   :  { %3226 = vrot.lane.b32.xlu0 %v3225_v48, %s3343_s17  ;;  %v3248_v48 = vld [vmem:[%s3953_s2 + $0x88] sm:$0xff]   ;;  %v3249_v50 = vld [vmem:[%s3953_s2 + $0x80] sm:$0xff]  }
 0xe18   :  { %v2406_v44 = vpop.f32.mrf.mxu1 }
 0xe19   :  { %v2798_v44 = vld [vmem:[%s3956_s3 + $0x13] ss:$0 sm:$0xff] }
 0xe1a   :  { %v3159_v51 = vpop.f32.mrf.mxu1 }
 0xe79   :  { %v3217_v49 = vpop.permute.xlu1 %3216 }
 0xe7a   :  { %v3219_v54 = vunpack.i.h.bf16 %v3217_v49  ;;  %v3218_v55 = vunpack.i.l.bf16 %v3217_v49 }
 0xe7c   :  { %v2421_v26 = vsel %vm181_vm2, %v2073_v33, %v3219_v54  ;;  %v1968_v59 = vsel %vm181_vm2, %v1619_v13, %v3218_v55 }
 0xe81   :  { %v3222_v52 = vpop.permute.xlu1 %3221 }
 0xe82   :  { %v3224_v56 = vunpack.i.h.bf16 %v3222_v52  ;;  %v3223_v57 = vunpack.i.l.bf16 %v3222_v52 }
 0xe84   :  { %v2422_v62 = vsel %vm631_vm4, %v2421_v26, %v3224_v56  ;;  %v1969_v63 = vsel %vm631_vm4, %v1968_v59, %v3223_v57 }
 0xe85   :  { %v2430_v53 = vpop.permute.xlu1 %2429 }
 0xe86   :  { %3163 = vmatpush3.bf16.msra.mxu0 %v2430_v53 }
 0xe87   :  { %3176 = vmatprep.subr.bf16.mxu0 %v3332_v0 }
 0xe89   :  { %v3227_v58 = vpop.permute.xlu0 %3226 }
 0xe8a   :  { %v3229_v60 = vunpack.i.h.bf16 %v3227_v58  ;;  %v3228_v61 = vunpack.i.l.bf16 %v3227_v58 }
 0xe8c   :  { %v2423_v2 = vsel %vm633_vm5, %v2422_v62, %v3229_v60  ;;  %v1970_v5 = vsel %vm633_vm5, %v1969_v63, %v3228_v61 }
 0xe8d   :  { %v2424_v6 = vpack.c.bf16 %v2423_v2, %v1970_v5 }
 0xe8f   :  { %3165 = vmatmul.mubr.msk.bf16.vlgmr.msra.gmra.mxu0 %vm71_vm1, %v2424_v6 }
 0xe90   :  { %3184 = vmatprep.mubr.msk.bf16.mxu0 %vm3333_vm0, %v3332_v0  ;;  %3177 = vmatpush3.bf16.msra.mxu0 %v3246_v29 }
 0xe91   :  { %3178 = vmatprep.subr.bf16.mxu0 %v3332_v0 }
 0xe94   :  { %3179 = vmatpush3.bf16.msra.mxu0 %v3247_v47 }
 0xe95   :  { %3180 = vmatprep.subr.bf16.mxu0 %v3332_v0 }
 0xe98   :  { %3181 = vmatpush3.bf16.msra.mxu0 %v3248_v48 }
 0xe99   :  { %3182 = vmatprep.subr.bf16.mxu0 %v3332_v0 }
 0xe9c   :  { %3183 = vmatpush3.bf16.msra.mxu0 %v3249_v50 }
 0xf4f   :  { %v2472_v1 = vpop.f32.mrf.mxu0 }
 0xf50   :  { %v2473_v8 = vadd.f32 %v2794_v7, %v2472_v1 }
 0xf51   :  { %v3166_v3 = vpop.f32.mrf.mxu0 }
 0xf52   :  { %v2479_v9 = vadd.f32 %v2473_v8, %v3675_v17 }
 0xf53   :  { %v2475_v10 = vpop.f32.mrf.mxu0 }
 0xf54   :  { %v2476_v4 = vadd.f32 %v2794_v7, %v2475_v10  ;;  %v2481_v11 = vsel %vm71_vm1, %v2479_v9, 0.0 }
 0xf55   :  { %2482 = vadd.xlane.f32.xlu0 %v2481_v11  ;;  %v3167_v12 = vpop.f32.mrf.mxu0 }
 0xf56   :  { %v2480_v13 = vadd.f32 %v2476_v4, %v3677_v18  ;;  %v3244_v18 = vld [vmem:[%s3953_s2 + $0x78] sm:$0xff]  }
 0xf57   :  { %3169 = vmatpush3.bf16.msra.mxu1 %v3244_v18 }
 0xf58   :  { %v2484_v14 = vsel %vm71_vm1, %v2480_v13, 0.0  ;;  %3170 = vmatprep.subr.bf16.mxu1 %v3332_v0  ;;  %v2802_v0 = vld [vmem:[%s3956_s3 + $0x14] ss:$0 sm:$0xff] }
 0xf59   :  { %2485 = vadd.xlane.f32.xlu1 %v2484_v14 }
 0xf5b   :  { %3171 = vmatpush3.bf16.msra.mxu1 %v3245_v20 }
 0xfde   :  { %v2483_v15 = vpop.xlane.xlu0 %2482 }
 0xfdf   :  { %v2487_v16 = vmul.f32 0.03125, %v2483_v15 }
 0xfe1   :  { %v2489_v21 = vsub.f32 %v2479_v9, %v2487_v16 }
 0xfe2   :  { %v2486_v22 = vpop.xlane.xlu1 %2485 }
 0xfe3   :  { %v2488_v23 = vmul.f32 0.03125, %v2486_v22  ;;  %v2491_v24 = vmul.f32 %v2489_v21, %v2489_v21 }
 0xfe5   :  { %v2490_v19 = vsub.f32 %v2480_v13, %v2488_v23  ;;  %v2493_v17 = vsel %vm71_vm1, %v2491_v24, 0.0 }
 0xfe6   :  { %2494 = vadd.xlane.f32.xlu0 %v2493_v17  ;;  %v2808_v17 = vld [vmem:[%s3956_s3 + $0x17] ss:$0 sm:$0xff] }
 0xfe7   :  { %v2492_v27 = vmul.f32 %v2490_v19, %v2490_v19 }
 0xfe9   :  { %v2496_v28 = vsel %vm71_vm1, %v2492_v27, 0.0 }
 0xfea   :  { %2497 = vadd.xlane.f32.xlu0 %v2496_v28  ;;  %v2809_v28 = vld [vmem:[%s3956_s3 + $0x18] ss:$0 sm:$0xff] }
0x106f   :  { %v2495_v30 = vpop.xlane.xlu0 %2494 }
0x1070   :  { %v2499_v31 = vmul.f32 0.03125, %v2495_v30 }
0x1072   :  { %v2501_v32 = vadd.f32 1e-05, %v2499_v31 }
0x1073   :  { %v2498_v33 = vpop.xlane.xlu0 %2497 }
0x1074   :  { %3322 = vrsqrt.f32 %v2501_v32  ;;  %v2500_v34 = vmul.f32 0.03125, %v2498_v33 }
0x1076   :  { %v2502_v35 = vadd.f32 1e-05, %v2500_v34 }
0x1078   :  { %3324 = vrsqrt.f32 %v2502_v35 }
0x1081   :  { %v3323_v36 = vpop.eup %3322 }
0x1082   :  { %v2505_v37 = vmul.f32 %v3323_v36, %v2489_v21 }
0x1084   :  { %v2511_v40 = vmul.f32 %v2796_v38, %v2505_v37 }
0x1085   :  { %v3325_v39 = vpop.eup %3324 }
0x1086   :  { %v2506_v25 = vmul.f32 %v3325_v39, %v2490_v19  ;;  %v2517_v43 = vadd.f32 %v2797_v41, %v2511_v40 }
0x1088   :  { %v2512_v42 = vmul.f32 %v2796_v38, %v2506_v25 }
0x108a   :  { %v2518_v45 = vadd.f32 %v2797_v41, %v2512_v42 }
0x108c   :  { %v2519_v46 = vpack.c.bf16 %v2518_v45, %v2517_v43 }
0x108e   :  { %3173 = vmatmul.mubr.msk.bf16.vlgmr.msra.gmra.mxu1 %vm71_vm1, %v2519_v46 }
0x114e   :  { %v2573_v51 = vpop.f32.mrf.mxu1 }
0x114f   :  { %v2574_v52 = vadd.f32 %v2798_v44, %v2573_v51 }
0x1150   :  { %v3174_v49 = vpop.f32.mrf.mxu1 }
0x1151   :  { %v2580_v56 = vmax.f32 %v2574_v52, 0.0 }
0x1152   :  { %v2576_v53 = vpop.f32.mrf.mxu1 }
0x1153   :  { %v2577_v54 = vadd.f32 %v2798_v44, %v2576_v53 }
0x1154   :  { %v3175_v55 = vpop.f32.mrf.mxu1 }
0x1155   :  { %v2581_v57 = vmax.f32 %v2577_v54, 0.0 }
0x1157   :  { %v2582_v58 = vpack.c.bf16 %v2581_v57, %v2580_v56 }
0x1159   :  { %3185 = vmatmul.mubr.msk.bf16.vlgmr.msra.gmra.mxu0 %vm1276_vm6, %v2582_v58 }
0x1219   :  { %v2648_v26 = vpop.f32.mrf.mxu0 }
0x121a   :  { %v2649_v59 = vadd.f32 %v2802_v0, %v2648_v26 }
0x121b   :  { %v3186_v60 = vpop.f32.mrf.mxu0 }
0x121c   :  { %v2655_v61 = vadd.f32 %v2649_v59, %v2517_v43 }
0x121d   :  { %v2651_v62 = vpop.f32.mrf.mxu0 }
0x121e   :  { %v2652_v63 = vadd.f32 %v2802_v0, %v2651_v62  ;;  %v2657_v2 = vsel %vm71_vm1, %v2655_v61, 0.0 }
0x121f   :  { %2658 = vadd.xlane.f32.xlu1 %v2657_v2  ;;  %v3187_v5 = vpop.f32.mrf.mxu0 }
0x1220   :  { %v2656_v6 = vadd.f32 %v2652_v63, %v2518_v45 }
0x1222   :  { %v2660_v7 = vsel %vm71_vm1, %v2656_v6, 0.0 }
0x1223   :  { %2661 = vadd.xlane.f32.xlu0 %v2660_v7 }
0x12a8   :  { %v2659_v1 = vpop.xlane.xlu1 %2658 }
0x12a9   :  { %v2663_v8 = vmul.f32 0.03125, %v2659_v1 }
0x12ab   :  { %v2665_v3 = vsub.f32 %v2655_v61, %v2663_v8 }
0x12ac   :  { %v2662_v9 = vpop.xlane.xlu0 %2661 }
0x12ad   :  { %v2664_v10 = vmul.f32 0.03125, %v2662_v9  ;;  %v2667_v4 = vmul.f32 %v2665_v3, %v2665_v3 }
0x12af   :  { %v2666_v11 = vsub.f32 %v2656_v6, %v2664_v10  ;;  %v2669_v12 = vsel %vm71_vm1, %v2667_v4, 0.0 }
0x12b0   :  { %2670 = vadd.xlane.f32.xlu1 %v2669_v12 }
0x12b1   :  { %v2668_v13 = vmul.f32 %v2666_v11, %v2666_v11 }
0x12b3   :  { %v2672_v14 = vsel %vm71_vm1, %v2668_v13, 0.0 }
0x12b4   :  { %2673 = vadd.xlane.f32.xlu0 %v2672_v14 }
0x1339   :  { %v2671_v15 = vpop.xlane.xlu1 %2670 }
0x133a   :  { %v2675_v16 = vmul.f32 0.03125, %v2671_v15 }
0x133c   :  { %v2677_v21 = vadd.f32 1e-05, %v2675_v16 }
0x133d   :  { %v2674_v22 = vpop.xlane.xlu0 %2673 }
0x133e   :  { %3326 = vrsqrt.f32 %v2677_v21  ;;  %v2676_v23 = vmul.f32 0.03125, %v2674_v22 }
0x1340   :  { %v2678_v24 = vadd.f32 1e-05, %v2676_v23 }
0x1342   :  { %3328 = vrsqrt.f32 %v2678_v24 }
0x134b   :  { %v3327_v19 = vpop.eup %3326 }
0x134c   :  { %v2681_v27 = vmul.f32 %v3327_v19, %v2665_v3 }
0x134e   :  { %v2687_v18 = vmul.f32 %v2808_v17, %v2681_v27 }
0x134f   :  { %v3329_v20 = vpop.eup %3328 }
0x1350   :  { %v2693_v29 = vadd.f32 %v2809_v28, %v2687_v18  ;;  %v2682_v30 = vmul.f32 %v3329_v20, %v2666_v11 }
0x1352   :  { %2695 = vst.msk [vmem:[%s3957_s4] sm:$0xff] %vm71_vm1, %v2693_v29  ;;  %v2688_v31 = vmul.f32 %v2808_v17, %v2682_v30 }
0x1354   :  { %v2694_v32 = vadd.f32 %v2809_v28, %v2688_v31 }
0x1356   :  { %2696 = vst.msk [vmem:[%s3957_s4 + $0x8] sm:$0xff] %vm71_vm1, %v2694_v32 }

</bundles_post_ra>
